<compile_context>
chip_gen: v6e
topology: v6e:2x2x1
jax: 0.10.0
libtpu: 0.0.40
codegen_flags: <defaults>
</compile_context>

<pallas_src>
import functools

import jax
import jax.numpy as jnp
from jax.experimental import pallas as pl
from jax.experimental.pallas import tpu as pltpu


_TM_TARGET = 512          # lane tile for the M = N*OH*OW axis (128-aligned)
_VMEM_LIMIT = 32 * 1024 * 1024


def _tiles(M):
    """Return (tm, num_tiles, padded_M) for tiling the M axis."""
    if M <= _TM_TARGET:
        return M, 1, M                     # single full-extent block
    tm = _TM_TARGET
    ntiles = -(-M // tm)
    return tm, ntiles, ntiles * tm


# ---------------------------------------------------------------------------
# Kernels
# ---------------------------------------------------------------------------

def _matmul_act_kernel(w_ref, x_ref, o_ref, *, act):
    """Y^T tile = W @ X^T tile, then activation. Used for conv1 / conv5."""
    w = w_ref[...]                                            # (Cout, K) bf16
    x = x_ref[...]                                            # (K, TM)  bf16
    y = jnp.dot(w, x, preferred_element_type=jnp.float32)     # (Cout, TM) f32
    if act == "lrelu":
        y = jnp.where(y > 0, y, 0.2 * y)                      # LeakyReLU(0.2)
    elif act == "sigmoid":
        y = pl.reciprocal(1.0 + jnp.exp(-y), approx=True)     # EUP reciprocal
        y = jnp.clip(y, 0.0, 1.0)                             # remove approx noise
    o_ref[...] = y.astype(o_ref.dtype)


def _matmul_stats_kernel(w_ref, x_ref, y_ref, stats_ref):
    """BN pass 1: matmul tile + per-tile per-channel (sum, sum_sq) partials."""
    w = w_ref[...]                                            # (Cout, K) bf16
    x = x_ref[...]                                            # (K, TM)  bf16
    y = jnp.dot(w, x, preferred_element_type=jnp.float32)     # (Cout, TM) f32
    y_ref[...] = y
    s = jnp.sum(y, axis=1, keepdims=True)                     # (Cout, 1)
    ss = jnp.sum(y * y, axis=1, keepdims=True)                # (Cout, 1)
    stats_ref[:, 0:1] = s
    stats_ref[:, 1:2] = ss


def _bn_act_kernel(mi_ref, y_ref, o_ref):
    """BN pass 2: normalize with precomputed (mean, inv_std) + LeakyReLU."""
    y = y_ref[...]                                            # (Cout, TM) f32
    mean = mi_ref[:, 0:1]                                     # (Cout, 1)
    inv = mi_ref[:, 1:2]                                      # (Cout, 1)
    y = (y - mean) * inv
    y = jnp.where(y > 0, y, 0.2 * y)                          # LeakyReLU(0.2)
    o_ref[...] = y.astype(o_ref.dtype)


# ---------------------------------------------------------------------------
# Pallas wrappers
# ---------------------------------------------------------------------------

def _compiler_params():
    return pltpu.CompilerParams(
        dimension_semantics=("parallel",),
        vmem_limit_bytes=_VMEM_LIMIT,
    )


def _matmul_act(w_mat, x_t, *, act, out_dtype):
    """(Cout, K) @ (K, M) + activation, M tiled on lanes."""
    Cout, K = w_mat.shape
    _, M = x_t.shape
    tm, ntiles, m_pad = _tiles(M)
    if m_pad != M:
        x_t = jnp.pad(x_t, ((0, 0), (0, m_pad - M)))
    y = pl.pallas_call(
        functools.partial(_matmul_act_kernel, act=act),
        out_shape=jax.ShapeDtypeStruct((Cout, m_pad), out_dtype),
        grid=(ntiles,),
        in_specs=[
            pl.BlockSpec((Cout, K), lambda i: (0, 0)),        # resident weights
            pl.BlockSpec((K, tm), lambda i: (0, i)),          # streamed patches
        ],
        out_specs=pl.BlockSpec((Cout, tm), lambda i: (0, i)),
        compiler_params=_compiler_params(),
    )(w_mat, x_t)
    return y[:, :M] if m_pad != M else y


def _matmul_bn_act(w_mat, x_t, *, eps=1e-5):
    """(Cout, K) @ (K, M) + BatchNorm (batch stats) + LeakyReLU, two passes."""
    Cout, K = w_mat.shape
    _, M = x_t.shape
    tm, ntiles, m_pad = _tiles(M)
    if m_pad != M:
        # Zero-padded columns contribute exactly 0 to sum / sum_sq.
        x_t = jnp.pad(x_t, ((0, 0), (0, m_pad - M)))

    # Pass 1: matmul tiles (f32 accumulator) + per-tile channel partial sums.
    y, stats = pl.pallas_call(
        _matmul_stats_kernel,
        out_shape=(
            jax.ShapeDtypeStruct((Cout, m_pad), jnp.float32),
            jax.ShapeDtypeStruct((ntiles, Cout, 2), jnp.float32),
        ),
        grid=(ntiles,),
        in_specs=[
            pl.BlockSpec((Cout, K), lambda i: (0, 0)),
            pl.BlockSpec((K, tm), lambda i: (0, i)),
        ],
        out_specs=(
            pl.BlockSpec((Cout, tm), lambda i: (0, i)),
            pl.BlockSpec((None, Cout, 2), lambda i: (i, 0, 0)),
        ),
        compiler_params=_compiler_params(),
    )(w_mat, x_t)

    # Tiny XLA reduction (ntiles x Cout x 2 values) -> mean / inv_std in f32.
    s = jnp.sum(stats, axis=0)                                # (Cout, 2)
    mean = s[:, 0] / M
    var = jnp.maximum(s[:, 1] / M - mean * mean, 0.0)         # biased variance
    inv = jax.lax.rsqrt(var + eps)
    mi = jnp.stack([mean, inv], axis=1)                       # (Cout, 2) f32

    # Pass 2: normalize + LeakyReLU, bf16 output for the next layer.
    out = pl.pallas_call(
        _bn_act_kernel,
        out_shape=jax.ShapeDtypeStruct((Cout, m_pad), jnp.bfloat16),
        grid=(ntiles,),
        in_specs=[
            pl.BlockSpec((Cout, 2), lambda i: (0, 0)),        # resident mean/inv
            pl.BlockSpec((Cout, tm), lambda i: (0, i)),
        ],
        out_specs=pl.BlockSpec((Cout, tm), lambda i: (0, i)),
        compiler_params=_compiler_params(),
    )(mi, y)
    return out[:, :M] if m_pad != M else out


# ---------------------------------------------------------------------------
# XLA glue: transposed im2col in the channels-first / batch-second layout
# ---------------------------------------------------------------------------

def im2col_T(a, k, s, p):
    """a: (C, N, H, W) -> X^T (C*k*k, N*OH*OW), K ordered (c, kh, kw)."""
    C, N, H, W = a.shape
    OH = (H + 2 * p - k) // s + 1
    OW = (W + 2 * p - k) // s + 1
    ap = jnp.pad(a, ((0, 0), (0, 0), (p, p), (p, p)))
    cols = []
    for i in range(k):
        for j in range(k):
            cols.append(ap[:, :, i:i + s * OH:s, j:j + s * OW:s])  # (C, N, OH, OW)
    xt = jnp.stack(cols, axis=1)                  # (C, k*k, N, OH, OW)
    xt = xt.reshape(C * k * k, N * OH * OW)       # matches PyTorch weight flatten
    return xt, OH, OW


def conv_act_layer(a, w, stride, pad, *, act, out_dtype=jnp.bfloat16):
    """Conv + activation. a: (Cin, N, H, W); w: (Cout, Cin, kh, kw)."""
    Cout, Cin, kh, kw = w.shape
    _, N, _, _ = a.shape
    x_t, OH, OW = im2col_T(a.astype(jnp.bfloat16), kh, stride, pad)
    w_mat = w.reshape(Cout, Cin * kh * kw).astype(jnp.bfloat16)
    y = _matmul_act(w_mat, x_t, act=act, out_dtype=out_dtype)  # (Cout, M)
    return y.reshape(Cout, N, OH, OW)


def conv_bn_layer(a, w, stride, pad):
    """Conv + BatchNorm2d (batch stats) + LeakyReLU(0.2)."""
    Cout, Cin, kh, kw = w.shape
    _, N, _, _ = a.shape
    x_t, OH, OW = im2col_T(a.astype(jnp.bfloat16), kh, stride, pad)
    w_mat = w.reshape(Cout, Cin * kh * kw).astype(jnp.bfloat16)
    y = _matmul_bn_act(w_mat, x_t)                              # (Cout, M)
    return y.reshape(Cout, N, OH, OW)


# ---------------------------------------------------------------------------
# Model
# ---------------------------------------------------------------------------

def init_params(key, n_channels, features_d):
    """Deterministic DCGAN-style N(0, 0.02) init; shapes follow __init__."""
    fd = features_d
    shapes = [
        (fd, n_channels, 4, 4),       # conv1
        (fd * 2, fd, 4, 4),           # conv2
        (fd * 4, fd * 2, 4, 4),       # conv3
        (fd * 8, fd * 4, 4, 4),       # conv4
        (1, fd * 8, 4, 4),            # conv5
    ]
    keys = jax.random.split(key, len(shapes))
    return [0.02 * jax.random.normal(k, s, dtype=jnp.float32)
            for k, s in zip(keys, shapes)]


@jax.jit
def discriminator_forward(x, params):
    w1, w2, w3, w4, w5 = params
    a = jnp.transpose(x, (1, 0, 2, 3))                 # NCHW -> (C, N, H, W) once
    a = conv_act_layer(a, w1, 2, 1, act="lrelu")       # Conv + LeakyReLU
    a = conv_bn_layer(a, w2, 2, 1)                     # Conv + BN + LeakyReLU
    a = conv_bn_layer(a, w3, 2, 1)                     # Conv + BN + LeakyReLU
    a = conv_bn_layer(a, w4, 2, 1)                     # Conv + BN + LeakyReLU
    a = conv_act_layer(a, w5, 1, 0, act="sigmoid",
                       out_dtype=jnp.float32)          # Conv + Sigmoid
    return jnp.transpose(a, (1, 0, 2, 3))              # -> (N, 1, 1, 1)


if __name__ == "__main__":
    # Architecture-consistent small shapes: the final 4x4/stride-1/pad-0 conv
    # requires a 64x64 input (64 -> 32 -> 16 -> 8 -> 4 -> 1).
    n_channels, features_d = 3, 8
    batch = 2

    key = jax.random.PRNGKey(0)
    k_x, k_w = jax.random.split(key)
    x = jax.random.normal(k_x, (batch, n_channels, 64, 64), dtype=jnp.float32)
    params = init_params(k_w, n_channels, features_d)

    out = discriminator_forward(x, params)
    out = jax.block_until_ready(out)
    assert out.shape == (batch, 1, 1, 1), out.shape
    assert bool(jnp.all((out >= 0.0) & (out <= 1.0)))
    print("KERNEL_OK")
</pallas_src>

<mosaic_0001>
module attributes {stable_mosaic.version = 11 : i64} {
  func.func @_matmul_act_kernel(%arg0: i32, %arg1: memref<8x48xbf16, #tpu.memory_space<vmem>>, %arg2: memref<48x512xbf16, #tpu.memory_space<vmem>>, %arg3: memref<8x512xbf16, #tpu.memory_space<vmem>>) attributes {dimension_semantics = [#tpu.dimension_semantics<parallel>], iteration_bounds = array<i64: 4>, scalar_prefetch = 0 : i64, scratch_operands = 0 : i64, tpu.core_type = #tpu.core_type<tc>, window_params = [{pipeline_mode = #tpu.pipeline_mode<synchronous>, transform_indices = @transform_0, window_bounds = array<i64: 8, 48>}, {transform_indices = @transform_1, window_bounds = array<i64: 48, 512>}, {transform_indices = @transform_2, window_bounds = array<i64: 8, 512>}]} {
    %c0 = arith.constant 0 : index
    %c0_0 = arith.constant 0 : index
    %0 = vector.load %arg1[%c0, %c0_0] : memref<8x48xbf16, #tpu.memory_space<vmem>>, vector<8x48xbf16>
    %c0_1 = arith.constant 0 : index
    %c0_2 = arith.constant 0 : index
    %1 = vector.load %arg2[%c0_1, %c0_2] : memref<48x512xbf16, #tpu.memory_space<vmem>>, vector<48x512xbf16>
    %cst = arith.constant dense<0.000000e+00> : vector<8x512xf32>
    %2 = tpu.matmul %0, %1, %cst {dimension_numbers = #tpu.dot_dimension_numbers<[1], [0], [0], [1], [0, 0, 1, 1], [], []>} : vector<8x48xbf16>, vector<48x512xbf16>, vector<8x512xf32> -> vector<8x512xf32>
    %cst_3 = arith.constant 0.000000e+00 : f32
    %3 = vector.broadcast %cst_3 : f32 to vector<8x512xf32>
    %4 = arith.cmpf ogt, %2, %3 : vector<8x512xf32>
    %cst_4 = arith.constant 2.000000e-01 : f32
    %5 = vector.broadcast %cst_4 : f32 to vector<8x512xf32>
    %6 = arith.mulf %5, %2 : vector<8x512xf32>
    %7 = arith.select %4, %2, %6 : vector<8x512xi1>, vector<8x512xf32>
    %8 = arith.truncf %7 : vector<8x512xf32> to vector<8x512xbf16>
    %c0_5 = arith.constant 0 : index
    %c0_6 = arith.constant 0 : index
    %9 = vector.load %arg3[%c0_5, %c0_6] : memref<8x512xbf16, #tpu.memory_space<vmem>>, vector<8x512xbf16>
    tpu.vector_store %arg3[%c0_5, %c0_6], %8 {strides = array<i32>} : memref<8x512xbf16, #tpu.memory_space<vmem>>, vector<8x512xbf16>,
    return
  }
  func.func @transform_0(%arg0: i32) -> (i32, i32) {
    %c0_i32 = arith.constant 0 : i32
    %c0_i32_0 = arith.constant 0 : i32
    %c0_i32_1 = arith.constant 0 : i32
    return %c0_i32, %c0_i32_0 : i32, i32
  }
  func.func @transform_1(%arg0: i32) -> (i32, i32) {
    %c0_i32 = arith.constant 0 : i32
    %c0_i32_0 = arith.constant 0 : i32
    return %c0_i32, %arg0 : i32, i32
  }
  func.func @transform_2(%arg0: i32) -> (i32, i32) {
    %c0_i32 = arith.constant 0 : i32
    %c0_i32_0 = arith.constant 0 : i32
    return %c0_i32, %arg0 : i32, i32
  }
}

module attributes {stable_mosaic.version = 11 : i64} {
  func.func @_matmul_stats_kernel(%arg0: i32, %arg1: memref<16x128xbf16, #tpu.memory_space<vmem>>, %arg2: memref<128x512xbf16, #tpu.memory_space<vmem>>, %arg3: memref<16x512xf32, #tpu.memory_space<vmem>>, %arg4: memref<1x16x2xf32, #tpu.memory_space<vmem>>) attributes {dimension_semantics = [#tpu.dimension_semantics<parallel>], iteration_bounds = array<i64: 1>, scalar_prefetch = 0 : i64, scratch_operands = 0 : i64, tpu.core_type = #tpu.core_type<tc>, window_params = [{pipeline_mode = #tpu.pipeline_mode<synchronous>, transform_indices = @transform_0, window_bounds = array<i64: 16, 128>}, {transform_indices = @transform_1, window_bounds = array<i64: 128, 512>}, {transform_indices = @transform_2, window_bounds = array<i64: 16, 512>}, {transform_indices = @transform_3, window_bounds = array<i64: 1, 16, 2>}]} {
    %c0 = arith.constant 0 : index
    %c0_0 = arith.constant 0 : index
    %0 = vector.load %arg1[%c0, %c0_0] : memref<16x128xbf16, #tpu.memory_space<vmem>>, vector<16x128xbf16>
    %c0_1 = arith.constant 0 : index
    %c0_2 = arith.constant 0 : index
    %1 = vector.load %arg2[%c0_1, %c0_2] : memref<128x512xbf16, #tpu.memory_space<vmem>>, vector<128x512xbf16>
    %cst = arith.constant dense<0.000000e+00> : vector<16x512xf32>
    %2 = tpu.matmul %0, %1, %cst {dimension_numbers = #tpu.dot_dimension_numbers<[1], [0], [0], [1], [0, 0, 1, 1], [], []>} : vector<16x128xbf16>, vector<128x512xbf16>, vector<16x512xf32> -> vector<16x512xf32>
    %c0_3 = arith.constant 0 : index
    %c0_4 = arith.constant 0 : index
    %3 = vector.load %arg3[%c0_3, %c0_4] : memref<16x512xf32, #tpu.memory_space<vmem>>, vector<16x512xf32>
    tpu.vector_store %arg3[%c0_3, %c0_4], %2 {strides = array<i32>} : memref<16x512xf32, #tpu.memory_space<vmem>>, vector<16x512xf32>,
    %cst_5 = arith.constant dense<0.000000e+00> : vector<16xf32>
    %4 = vector.multi_reduction <add>, %2, %cst_5 [1] : vector<16x512xf32> to vector<16xf32>
    %5 = vector.shape_cast %4 : vector<16xf32> to vector<16x1xf32>
    %6 = arith.mulf %2, %2 : vector<16x512xf32>
    %cst_6 = arith.constant dense<0.000000e+00> : vector<16xf32>
    %7 = vector.multi_reduction <add>, %6, %cst_6 [1] : vector<16x512xf32> to vector<16xf32>
    %8 = vector.shape_cast %7 : vector<16xf32> to vector<16x1xf32>
    %c0_7 = arith.constant 0 : index
    %c0_8 = arith.constant 0 : index
    %c0_9 = arith.constant 0 : index
    %9 = vector.load %arg4[%c0_7, %c0_8, %c0_9] : memref<1x16x2xf32, #tpu.memory_space<vmem>>, vector<1x16x1xf32>
    %10 = vector.shape_cast %9 : vector<1x16x1xf32> to vector<16x1xf32>
    %11 = vector.shape_cast %5 : vector<16x1xf32> to vector<1x16x1xf32>
    tpu.vector_store %arg4[%c0_7, %c0_8, %c0_9], %11 {strides = array<i32>} : memref<1x16x2xf32, #tpu.memory_space<vmem>>, vector<1x16x1xf32>,
    %c0_10 = arith.constant 0 : index
    %c0_11 = arith.constant 0 : index
    %c1 = arith.constant 1 : index
    %12 = vector.load %arg4[%c0_10, %c0_11, %c1] : memref<1x16x2xf32, #tpu.memory_space<vmem>>, vector<1x16x1xf32>
    %13 = vector.shape_cast %12 : vector<1x16x1xf32> to vector<16x1xf32>
    %14 = vector.shape_cast %8 : vector<16x1xf32> to vector<1x16x1xf32>
    tpu.vector_store %arg4[%c0_10, %c0_11, %c1], %14 {strides = array<i32>} : memref<1x16x2xf32, #tpu.memory_space<vmem>>, vector<1x16x1xf32>,
    return
  }
  func.func @transform_0(%arg0: i32) -> (i32, i32) {
    %c0_i32 = arith.constant 0 : i32
    %c0_i32_0 = arith.constant 0 : i32
    %c0_i32_1 = arith.constant 0 : i32
    return %c0_i32, %c0_i32_0 : i32, i32
  }
  func.func @transform_1(%arg0: i32) -> (i32, i32) {
    %c0_i32 = arith.constant 0 : i32
    %c0_i32_0 = arith.constant 0 : i32
    return %c0_i32, %arg0 : i32, i32
  }
  func.func @transform_2(%arg0: i32) -> (i32, i32) {
    %c0_i32 = arith.constant 0 : i32
    %c0_i32_0 = arith.constant 0 : i32
    return %c0_i32, %arg0 : i32, i32
  }
  func.func @transform_3(%arg0: i32) -> (i32, i32, i32) {
    %c0_i32 = arith.constant 0 : i32
    %c0_i32_0 = arith.constant 0 : i32
    %c0_i32_1 = arith.constant 0 : i32
    return %arg0, %c0_i32, %c0_i32_0 : i32, i32, i32
  }
}

module attributes {stable_mosaic.version = 11 : i64} {
  func.func @_bn_act_kernel(%arg0: i32, %arg1: memref<16x2xf32, #tpu.memory_space<vmem>>, %arg2: memref<16x512xf32, #tpu.memory_space<vmem>>, %arg3: memref<16x512xbf16, #tpu.memory_space<vmem>>) attributes {dimension_semantics = [#tpu.dimension_semantics<parallel>], iteration_bounds = array<i64: 1>, scalar_prefetch = 0 : i64, scratch_operands = 0 : i64, tpu.core_type = #tpu.core_type<tc>, window_params = [{pipeline_mode = #tpu.pipeline_mode<synchronous>, transform_indices = @transform_0, window_bounds = array<i64: 16, 2>}, {transform_indices = @transform_1, window_bounds = array<i64: 16, 512>}, {transform_indices = @transform_2, window_bounds = array<i64: 16, 512>}]} {
    %c0 = arith.constant 0 : index
    %c0_0 = arith.constant 0 : index
    %0 = vector.load %arg2[%c0, %c0_0] : memref<16x512xf32, #tpu.memory_space<vmem>>, vector<16x512xf32>
    %c0_1 = arith.constant 0 : index
    %c0_2 = arith.constant 0 : index
    %1 = vector.load %arg1[%c0_1, %c0_2] : memref<16x2xf32, #tpu.memory_space<vmem>>, vector<16x1xf32>
    %c0_3 = arith.constant 0 : index
    %c1 = arith.constant 1 : index
    %2 = vector.load %arg1[%c0_3, %c1] : memref<16x2xf32, #tpu.memory_space<vmem>>, vector<16x1xf32>
    %3 = vector.broadcast %1 : vector<16x1xf32> to vector<16x512xf32>
    %4 = arith.subf %0, %3 : vector<16x512xf32>
    %5 = vector.broadcast %2 : vector<16x1xf32> to vector<16x512xf32>
    %6 = arith.mulf %4, %5 : vector<16x512xf32>
    %cst = arith.constant 0.000000e+00 : f32
    %7 = vector.broadcast %cst : f32 to vector<16x512xf32>
    %8 = arith.cmpf ogt, %6, %7 : vector<16x512xf32>
    %cst_4 = arith.constant 2.000000e-01 : f32
    %9 = vector.broadcast %cst_4 : f32 to vector<16x512xf32>
    %10 = arith.mulf %9, %6 : vector<16x512xf32>
    %11 = arith.select %8, %6, %10 : vector<16x512xi1>, vector<16x512xf32>
    %12 = arith.truncf %11 : vector<16x512xf32> to vector<16x512xbf16>
    %c0_5 = arith.constant 0 : index
    %c0_6 = arith.constant 0 : index
    %13 = vector.load %arg3[%c0_5, %c0_6] : memref<16x512xbf16, #tpu.memory_space<vmem>>, vector<16x512xbf16>
    tpu.vector_store %arg3[%c0_5, %c0_6], %12 {strides = array<i32>} : memref<16x512xbf16, #tpu.memory_space<vmem>>, vector<16x512xbf16>,
    return
  }
  func.func @transform_0(%arg0: i32) -> (i32, i32) {
    %c0_i32 = arith.constant 0 : i32
    %c0_i32_0 = arith.constant 0 : i32
    %c0_i32_1 = arith.constant 0 : i32
    return %c0_i32, %c0_i32_0 : i32, i32
  }
  func.func @transform_1(%arg0: i32) -> (i32, i32) {
    %c0_i32 = arith.constant 0 : i32
    %c0_i32_0 = arith.constant 0 : i32
    return %c0_i32, %arg0 : i32, i32
  }
  func.func @transform_2(%arg0: i32) -> (i32, i32) {
    %c0_i32 = arith.constant 0 : i32
    %c0_i32_0 = arith.constant 0 : i32
    return %c0_i32, %arg0 : i32, i32
  }
}

module attributes {stable_mosaic.version = 11 : i64} {
  func.func @_matmul_stats_kernel(%arg0: i32, %arg1: memref<32x256xbf16, #tpu.memory_space<vmem>>, %arg2: memref<256x128xbf16, #tpu.memory_space<vmem>>, %arg3: memref<32x128xf32, #tpu.memory_space<vmem>>, %arg4: memref<1x32x2xf32, #tpu.memory_space<vmem>>) attributes {dimension_semantics = [#tpu.dimension_semantics<parallel>], iteration_bounds = array<i64: 1>, scalar_prefetch = 0 : i64, scratch_operands = 0 : i64, tpu.core_type = #tpu.core_type<tc>, window_params = [{pipeline_mode = #tpu.pipeline_mode<synchronous>, transform_indices = @transform_0, window_bounds = array<i64: 32, 256>}, {transform_indices = @transform_1, window_bounds = array<i64: 256, 128>}, {transform_indices = @transform_2, window_bounds = array<i64: 32, 128>}, {transform_indices = @transform_3, window_bounds = array<i64: 1, 32, 2>}]} {
    %c0 = arith.constant 0 : index
    %c0_0 = arith.constant 0 : index
    %0 = vector.load %arg1[%c0, %c0_0] : memref<32x256xbf16, #tpu.memory_space<vmem>>, vector<32x256xbf16>
    %c0_1 = arith.constant 0 : index
    %c0_2 = arith.constant 0 : index
    %1 = vector.load %arg2[%c0_1, %c0_2] : memref<256x128xbf16, #tpu.memory_space<vmem>>, vector<256x128xbf16>
    %cst = arith.constant dense<0.000000e+00> : vector<32x128xf32>
    %2 = tpu.matmul %0, %1, %cst {dimension_numbers = #tpu.dot_dimension_numbers<[1], [0], [0], [1], [0, 0, 1, 1], [], []>} : vector<32x256xbf16>, vector<256x128xbf16>, vector<32x128xf32> -> vector<32x128xf32>
    %c0_3 = arith.constant 0 : index
    %c0_4 = arith.constant 0 : index
    %3 = vector.load %arg3[%c0_3, %c0_4] : memref<32x128xf32, #tpu.memory_space<vmem>>, vector<32x128xf32>
    tpu.vector_store %arg3[%c0_3, %c0_4], %2 {strides = array<i32>} : memref<32x128xf32, #tpu.memory_space<vmem>>, vector<32x128xf32>,
    %cst_5 = arith.constant dense<0.000000e+00> : vector<32xf32>
    %4 = vector.multi_reduction <add>, %2, %cst_5 [1] : vector<32x128xf32> to vector<32xf32>
    %5 = vector.shape_cast %4 : vector<32xf32> to vector<32x1xf32>
    %6 = arith.mulf %2, %2 : vector<32x128xf32>
    %cst_6 = arith.constant dense<0.000000e+00> : vector<32xf32>
    %7 = vector.multi_reduction <add>, %6, %cst_6 [1] : vector<32x128xf32> to vector<32xf32>
    %8 = vector.shape_cast %7 : vector<32xf32> to vector<32x1xf32>
    %c0_7 = arith.constant 0 : index
    %c0_8 = arith.constant 0 : index
    %c0_9 = arith.constant 0 : index
    %9 = vector.load %arg4[%c0_7, %c0_8, %c0_9] : memref<1x32x2xf32, #tpu.memory_space<vmem>>, vector<1x32x1xf32>
    %10 = vector.shape_cast %9 : vector<1x32x1xf32> to vector<32x1xf32>
    %11 = vector.shape_cast %5 : vector<32x1xf32> to vector<1x32x1xf32>
    tpu.vector_store %arg4[%c0_7, %c0_8, %c0_9], %11 {strides = array<i32>} : memref<1x32x2xf32, #tpu.memory_space<vmem>>, vector<1x32x1xf32>,
    %c0_10 = arith.constant 0 : index
    %c0_11 = arith.constant 0 : index
    %c1 = arith.constant 1 : index
    %12 = vector.load %arg4[%c0_10, %c0_11, %c1] : memref<1x32x2xf32, #tpu.memory_space<vmem>>, vector<1x32x1xf32>
    %13 = vector.shape_cast %12 : vector<1x32x1xf32> to vector<32x1xf32>
    %14 = vector.shape_cast %8 : vector<32x1xf32> to vector<1x32x1xf32>
    tpu.vector_store %arg4[%c0_10, %c0_11, %c1], %14 {strides = array<i32>} : memref<1x32x2xf32, #tpu.memory_space<vmem>>, vector<1x32x1xf32>,
    return
  }
  func.func @transform_0(%arg0: i32) -> (i32, i32) {
    %c0_i32 = arith.constant 0 : i32
    %c0_i32_0 = arith.constant 0 : i32
    %c0_i32_1 = arith.constant 0 : i32
    return %c0_i32, %c0_i32_0 : i32, i32
  }
  func.func @transform_1(%arg0: i32) -> (i32, i32) {
    %c0_i32 = arith.constant 0 : i32
    %c0_i32_0 = arith.constant 0 : i32
    return %c0_i32, %arg0 : i32, i32
  }
  func.func @transform_2(%arg0: i32) -> (i32, i32) {
    %c0_i32 = arith.constant 0 : i32
    %c0_i32_0 = arith.constant 0 : i32
    return %c0_i32, %arg0 : i32, i32
  }
  func.func @transform_3(%arg0: i32) -> (i32, i32, i32) {
    %c0_i32 = arith.constant 0 : i32
    %c0_i32_0 = arith.constant 0 : i32
    %c0_i32_1 = arith.constant 0 : i32
    return %arg0, %c0_i32, %c0_i32_0 : i32, i32, i32
  }
}

module attributes {stable_mosaic.version = 11 : i64} {
  func.func @_bn_act_kernel(%arg0: i32, %arg1: memref<32x2xf32, #tpu.memory_space<vmem>>, %arg2: memref<32x128xf32, #tpu.memory_space<vmem>>, %arg3: memref<32x128xbf16, #tpu.memory_space<vmem>>) attributes {dimension_semantics = [#tpu.dimension_semantics<parallel>], iteration_bounds = array<i64: 1>, scalar_prefetch = 0 : i64, scratch_operands = 0 : i64, tpu.core_type = #tpu.core_type<tc>, window_params = [{pipeline_mode = #tpu.pipeline_mode<synchronous>, transform_indices = @transform_0, window_bounds = array<i64: 32, 2>}, {transform_indices = @transform_1, window_bounds = array<i64: 32, 128>}, {transform_indices = @transform_2, window_bounds = array<i64: 32, 128>}]} {
    %c0 = arith.constant 0 : index
    %c0_0 = arith.constant 0 : index
    %0 = vector.load %arg2[%c0, %c0_0] : memref<32x128xf32, #tpu.memory_space<vmem>>, vector<32x128xf32>
    %c0_1 = arith.constant 0 : index
    %c0_2 = arith.constant 0 : index
    %1 = vector.load %arg1[%c0_1, %c0_2] : memref<32x2xf32, #tpu.memory_space<vmem>>, vector<32x1xf32>
    %c0_3 = arith.constant 0 : index
    %c1 = arith.constant 1 : index
    %2 = vector.load %arg1[%c0_3, %c1] : memref<32x2xf32, #tpu.memory_space<vmem>>, vector<32x1xf32>
    %3 = vector.broadcast %1 : vector<32x1xf32> to vector<32x128xf32>
    %4 = arith.subf %0, %3 : vector<32x128xf32>
    %5 = vector.broadcast %2 : vector<32x1xf32> to vector<32x128xf32>
    %6 = arith.mulf %4, %5 : vector<32x128xf32>
    %cst = arith.constant 0.000000e+00 : f32
    %7 = vector.broadcast %cst : f32 to vector<32x128xf32>
    %8 = arith.cmpf ogt, %6, %7 : vector<32x128xf32>
    %cst_4 = arith.constant 2.000000e-01 : f32
    %9 = vector.broadcast %cst_4 : f32 to vector<32x128xf32>
    %10 = arith.mulf %9, %6 : vector<32x128xf32>
    %11 = arith.select %8, %6, %10 : vector<32x128xi1>, vector<32x128xf32>
    %12 = arith.truncf %11 : vector<32x128xf32> to vector<32x128xbf16>
    %c0_5 = arith.constant 0 : index
    %c0_6 = arith.constant 0 : index
    %13 = vector.load %arg3[%c0_5, %c0_6] : memref<32x128xbf16, #tpu.memory_space<vmem>>, vector<32x128xbf16>
    tpu.vector_store %arg3[%c0_5, %c0_6], %12 {strides = array<i32>} : memref<32x128xbf16, #tpu.memory_space<vmem>>, vector<32x128xbf16>,
    return
  }
  func.func @transform_0(%arg0: i32) -> (i32, i32) {
    %c0_i32 = arith.constant 0 : i32
    %c0_i32_0 = arith.constant 0 : i32
    %c0_i32_1 = arith.constant 0 : i32
    return %c0_i32, %c0_i32_0 : i32, i32
  }
  func.func @transform_1(%arg0: i32) -> (i32, i32) {
    %c0_i32 = arith.constant 0 : i32
    %c0_i32_0 = arith.constant 0 : i32
    return %c0_i32, %arg0 : i32, i32
  }
  func.func @transform_2(%arg0: i32) -> (i32, i32) {
    %c0_i32 = arith.constant 0 : i32
    %c0_i32_0 = arith.constant 0 : i32
    return %c0_i32, %arg0 : i32, i32
  }
}

module attributes {stable_mosaic.version = 11 : i64} {
  func.func @_matmul_stats_kernel(%arg0: i32, %arg1: memref<64x512xbf16, #tpu.memory_space<vmem>>, %arg2: memref<512x32xbf16, #tpu.memory_space<vmem>>, %arg3: memref<64x32xf32, #tpu.memory_space<vmem>>, %arg4: memref<1x64x2xf32, #tpu.memory_space<vmem>>) attributes {dimension_semantics = [#tpu.dimension_semantics<parallel>], iteration_bounds = array<i64: 1>, scalar_prefetch = 0 : i64, scratch_operands = 0 : i64, tpu.core_type = #tpu.core_type<tc>, window_params = [{pipeline_mode = #tpu.pipeline_mode<synchronous>, transform_indices = @transform_0, window_bounds = array<i64: 64, 512>}, {transform_indices = @transform_1, window_bounds = array<i64: 512, 32>}, {transform_indices = @transform_2, window_bounds = array<i64: 64, 32>}, {transform_indices = @transform_3, window_bounds = array<i64: 1, 64, 2>}]} {
    %c0 = arith.constant 0 : index
    %c0_0 = arith.constant 0 : index
    %0 = vector.load %arg1[%c0, %c0_0] : memref<64x512xbf16, #tpu.memory_space<vmem>>, vector<64x512xbf16>
    %c0_1 = arith.constant 0 : index
    %c0_2 = arith.constant 0 : index
    %1 = vector.load %arg2[%c0_1, %c0_2] : memref<512x32xbf16, #tpu.memory_space<vmem>>, vector<512x32xbf16>
    %cst = arith.constant dense<0.000000e+00> : vector<64x32xf32>
    %2 = tpu.matmul %0, %1, %cst {dimension_numbers = #tpu.dot_dimension_numbers<[1], [0], [0], [1], [0, 0, 1, 1], [], []>} : vector<64x512xbf16>, vector<512x32xbf16>, vector<64x32xf32> -> vector<64x32xf32>
    %c0_3 = arith.constant 0 : index
    %c0_4 = arith.constant 0 : index
    %3 = vector.load %arg3[%c0_3, %c0_4] : memref<64x32xf32, #tpu.memory_space<vmem>>, vector<64x32xf32>
    tpu.vector_store %arg3[%c0_3, %c0_4], %2 {strides = array<i32>} : memref<64x32xf32, #tpu.memory_space<vmem>>, vector<64x32xf32>,
    %cst_5 = arith.constant dense<0.000000e+00> : vector<64xf32>
    %4 = vector.multi_reduction <add>, %2, %cst_5 [1] : vector<64x32xf32> to vector<64xf32>
    %5 = vector.shape_cast %4 : vector<64xf32> to vector<64x1xf32>
    %6 = arith.mulf %2, %2 : vector<64x32xf32>
    %cst_6 = arith.constant dense<0.000000e+00> : vector<64xf32>
    %7 = vector.multi_reduction <add>, %6, %cst_6 [1] : vector<64x32xf32> to vector<64xf32>
    %8 = vector.shape_cast %7 : vector<64xf32> to vector<64x1xf32>
    %c0_7 = arith.constant 0 : index
    %c0_8 = arith.constant 0 : index
    %c0_9 = arith.constant 0 : index
    %9 = vector.load %arg4[%c0_7, %c0_8, %c0_9] : memref<1x64x2xf32, #tpu.memory_space<vmem>>, vector<1x64x1xf32>
    %10 = vector.shape_cast %9 : vector<1x64x1xf32> to vector<64x1xf32>
    %11 = vector.shape_cast %5 : vector<64x1xf32> to vector<1x64x1xf32>
    tpu.vector_store %arg4[%c0_7, %c0_8, %c0_9], %11 {strides = array<i32>} : memref<1x64x2xf32, #tpu.memory_space<vmem>>, vector<1x64x1xf32>,
    %c0_10 = arith.constant 0 : index
    %c0_11 = arith.constant 0 : index
    %c1 = arith.constant 1 : index
    %12 = vector.load %arg4[%c0_10, %c0_11, %c1] : memref<1x64x2xf32, #tpu.memory_space<vmem>>, vector<1x64x1xf32>
    %13 = vector.shape_cast %12 : vector<1x64x1xf32> to vector<64x1xf32>
    %14 = vector.shape_cast %8 : vector<64x1xf32> to vector<1x64x1xf32>
    tpu.vector_store %arg4[%c0_10, %c0_11, %c1], %14 {strides = array<i32>} : memref<1x64x2xf32, #tpu.memory_space<vmem>>, vector<1x64x1xf32>,
    return
  }
  func.func @transform_0(%arg0: i32) -> (i32, i32) {
    %c0_i32 = arith.constant 0 : i32
    %c0_i32_0 = arith.constant 0 : i32
    %c0_i32_1 = arith.constant 0 : i32
    return %c0_i32, %c0_i32_0 : i32, i32
  }
  func.func @transform_1(%arg0: i32) -> (i32, i32) {
    %c0_i32 = arith.constant 0 : i32
    %c0_i32_0 = arith.constant 0 : i32
    return %c0_i32, %arg0 : i32, i32
  }
  func.func @transform_2(%arg0: i32) -> (i32, i32) {
    %c0_i32 = arith.constant 0 : i32
    %c0_i32_0 = arith.constant 0 : i32
    return %c0_i32, %arg0 : i32, i32
  }
  func.func @transform_3(%arg0: i32) -> (i32, i32, i32) {
    %c0_i32 = arith.constant 0 : i32
    %c0_i32_0 = arith.constant 0 : i32
    %c0_i32_1 = arith.constant 0 : i32
    return %arg0, %c0_i32, %c0_i32_0 : i32, i32, i32
  }
}

module attributes {stable_mosaic.version = 11 : i64} {
  func.func @_bn_act_kernel(%arg0: i32, %arg1: memref<64x2xf32, #tpu.memory_space<vmem>>, %arg2: memref<64x32xf32, #tpu.memory_space<vmem>>, %arg3: memref<64x32xbf16, #tpu.memory_space<vmem>>) attributes {dimension_semantics = [#tpu.dimension_semantics<parallel>], iteration_bounds = array<i64: 1>, scalar_prefetch = 0 : i64, scratch_operands = 0 : i64, tpu.core_type = #tpu.core_type<tc>, window_params = [{pipeline_mode = #tpu.pipeline_mode<synchronous>, transform_indices = @transform_0, window_bounds = array<i64: 64, 2>}, {transform_indices = @transform_1, window_bounds = array<i64: 64, 32>}, {transform_indices = @transform_2, window_bounds = array<i64: 64, 32>}]} {
    %c0 = arith.constant 0 : index
    %c0_0 = arith.constant 0 : index
    %0 = vector.load %arg2[%c0, %c0_0] : memref<64x32xf32, #tpu.memory_space<vmem>>, vector<64x32xf32>
    %c0_1 = arith.constant 0 : index
    %c0_2 = arith.constant 0 : index
    %1 = vector.load %arg1[%c0_1, %c0_2] : memref<64x2xf32, #tpu.memory_space<vmem>>, vector<64x1xf32>
    %c0_3 = arith.constant 0 : index
    %c1 = arith.constant 1 : index
    %2 = vector.load %arg1[%c0_3, %c1] : memref<64x2xf32, #tpu.memory_space<vmem>>, vector<64x1xf32>
    %3 = vector.broadcast %1 : vector<64x1xf32> to vector<64x32xf32>
    %4 = arith.subf %0, %3 : vector<64x32xf32>
    %5 = vector.broadcast %2 : vector<64x1xf32> to vector<64x32xf32>
    %6 = arith.mulf %4, %5 : vector<64x32xf32>
    %cst = arith.constant 0.000000e+00 : f32
    %7 = vector.broadcast %cst : f32 to vector<64x32xf32>
    %8 = arith.cmpf ogt, %6, %7 : vector<64x32xf32>
    %cst_4 = arith.constant 2.000000e-01 : f32
    %9 = vector.broadcast %cst_4 : f32 to vector<64x32xf32>
    %10 = arith.mulf %9, %6 : vector<64x32xf32>
    %11 = arith.select %8, %6, %10 : vector<64x32xi1>, vector<64x32xf32>
    %12 = arith.truncf %11 : vector<64x32xf32> to vector<64x32xbf16>
    %c0_5 = arith.constant 0 : index
    %c0_6 = arith.constant 0 : index
    %13 = vector.load %arg3[%c0_5, %c0_6] : memref<64x32xbf16, #tpu.memory_space<vmem>>, vector<64x32xbf16>
    tpu.vector_store %arg3[%c0_5, %c0_6], %12 {strides = array<i32>} : memref<64x32xbf16, #tpu.memory_space<vmem>>, vector<64x32xbf16>,
    return
  }
  func.func @transform_0(%arg0: i32) -> (i32, i32) {
    %c0_i32 = arith.constant 0 : i32
    %c0_i32_0 = arith.constant 0 : i32
    %c0_i32_1 = arith.constant 0 : i32
    return %c0_i32, %c0_i32_0 : i32, i32
  }
  func.func @transform_1(%arg0: i32) -> (i32, i32) {
    %c0_i32 = arith.constant 0 : i32
    %c0_i32_0 = arith.constant 0 : i32
    return %c0_i32, %arg0 : i32, i32
  }
  func.func @transform_2(%arg0: i32) -> (i32, i32) {
    %c0_i32 = arith.constant 0 : i32
    %c0_i32_0 = arith.constant 0 : i32
    return %c0_i32, %arg0 : i32, i32
  }
}

module attributes {stable_mosaic.version = 11 : i64} {
  func.func @_matmul_act_kernel(%arg0: i32, %arg1: memref<1x1024xbf16, #tpu.memory_space<vmem>>, %arg2: memref<1024x2xbf16, #tpu.memory_space<vmem>>, %arg3: memref<1x2xf32, #tpu.memory_space<vmem>>) attributes {dimension_semantics = [#tpu.dimension_semantics<parallel>], iteration_bounds = array<i64: 1>, scalar_prefetch = 0 : i64, scratch_operands = 0 : i64, tpu.core_type = #tpu.core_type<tc>, window_params = [{pipeline_mode = #tpu.pipeline_mode<synchronous>, transform_indices = @transform_0, window_bounds = array<i64: 1, 1024>}, {transform_indices = @transform_1, window_bounds = array<i64: 1024, 2>}, {transform_indices = @transform_2, window_bounds = array<i64: 1, 2>}]} {
    %c0 = arith.constant 0 : index
    %c0_0 = arith.constant 0 : index
    %0 = vector.load %arg1[%c0, %c0_0] : memref<1x1024xbf16, #tpu.memory_space<vmem>>, vector<1x1024xbf16>
    %c0_1 = arith.constant 0 : index
    %c0_2 = arith.constant 0 : index
    %1 = vector.load %arg2[%c0_1, %c0_2] : memref<1024x2xbf16, #tpu.memory_space<vmem>>, vector<1024x2xbf16>
    %cst = arith.constant dense<0.000000e+00> : vector<1x2xf32>
    %2 = tpu.matmul %0, %1, %cst {dimension_numbers = #tpu.dot_dimension_numbers<[1], [0], [0], [1], [0, 0, 1, 1], [], []>} : vector<1x1024xbf16>, vector<1024x2xbf16>, vector<1x2xf32> -> vector<1x2xf32>
    %cst_3 = arith.constant 0.000000e+00 : f32
    %3 = vector.broadcast %cst_3 : f32 to vector<1x2xf32>
    %4 = arith.subf %3, %2 : vector<1x2xf32>
    %5 = math.exp %4 : vector<1x2xf32>
    %cst_4 = arith.constant 1.000000e+00 : f32
    %6 = vector.broadcast %cst_4 : f32 to vector<1x2xf32>
    %7 = arith.addf %6, %5 : vector<1x2xf32>
    %8 = tpu.reciprocal %7 {approx = true} : vector<1x2xf32> -> vector<1x2xf32>
    %cst_5 = arith.constant 0.000000e+00 : f32
    %cst_6 = arith.constant 1.000000e+00 : f32
    %9 = vector.broadcast %cst_5 : f32 to vector<1x2xf32>
    %10 = arith.maximumf %9, %8 : vector<1x2xf32>
    %11 = vector.broadcast %cst_6 : f32 to vector<1x2xf32>
    %12 = arith.minimumf %11, %10 : vector<1x2xf32>
    %c0_7 = arith.constant 0 : index
    %c0_8 = arith.constant 0 : index
    %13 = vector.load %arg3[%c0_7, %c0_8] : memref<1x2xf32, #tpu.memory_space<vmem>>, vector<1x2xf32>
    tpu.vector_store %arg3[%c0_7, %c0_8], %12 {strides = array<i32>} : memref<1x2xf32, #tpu.memory_space<vmem>>, vector<1x2xf32>,
    return
  }
  func.func @transform_0(%arg0: i32) -> (i32, i32) {
    %c0_i32 = arith.constant 0 : i32
    %c0_i32_0 = arith.constant 0 : i32
    %c0_i32_1 = arith.constant 0 : i32
    return %c0_i32, %c0_i32_0 : i32, i32
  }
  func.func @transform_1(%arg0: i32) -> (i32, i32) {
    %c0_i32 = arith.constant 0 : i32
    %c0_i32_0 = arith.constant 0 : i32
    return %c0_i32, %arg0 : i32, i32
  }
  func.func @transform_2(%arg0: i32) -> (i32, i32) {
    %c0_i32 = arith.constant 0 : i32
    %c0_i32_0 = arith.constant 0 : i32
    return %c0_i32, %arg0 : i32, i32
  }
}

</mosaic_0001>

<bundles_post_ra>
// kernel: discriminator_forward.8
= control target key start
LH: loop header
LB: loop body
LE: loop exit
PB: predicated region body
PF: predicated region fallthrough
CT: control target
= control target key end

     0   :  { %s555_s9 = smov 0   ;;  %s557_s10 = smov 0   ;;  %s610_s0 = inlined_call_operand.vmem [shape: bf16[8,48], index: 0, kind: input, shape index: {}]   ;;  %s611_s1 = inlined_call_operand.vmem [shape: bf16[48,2048], index: 1, kind: input, shape index: {}]   ;;  %s612_s2 = inlined_call_operand.vmem [shape: bf16[8,2048], index: 2, kind: output, shape index: {}]  }
   0x1   :  { %s559_s11 = smov 0  }
   0x2 LB: > { %s440_s12 = sadd.s32 4294967295, %s537_s11   ;;  %s572_s13 = sadd.s32 1, %s537_s11   ;;  %s537_s11 = sphi %s559_s11, %s615_s11   ;;  %s533_s10 = sphi %s557_s10, %s614_s10   ;;  %s529_s9 = sphi %s555_s9, %s613_s9  }
   0x3   : > { %s37_s14 = ssub.s32 %s537_s11, %s572_s13  ;;  %s40_s15 = sadd.s32 1, %s533_s10 }
   0x4   : > { %p38_p0 = scmp.eq.s32.totalorder %s37_s14, 0  ;;  %p47_p1 = scmp.ne.s32.totalorder %s533_s10, %s529_s9 }
   0x5   : > { %p48_p2 = scmp.eq.s32.totalorder %s537_s11, 0  ;;  %p443_p4 = scmp.ge.s32.totalorder %s537_s11, 4 }
   0x6   : > { %s581_s16 = scalar_select %p38_p0, %s533_s10, %s40_s15  }
   0x7   : > { %p49_p3 = por %p48_p2, %p47_p1  ;;  %102 = sbr.rel (%p443_p4) target bundleno = 22 (0x16), region = 20 }
   0xc   : > { %105 = sbr.rel (!%p49_p3) target bundleno = 22 (0x16), region = 24  ;;  %s107_s17 = sand.u32 (%p49_p3), 1, %s533_s10  }
   0xd   : > { %s467_s18 = sshll.u32 (%p49_p3), %s537_s11, 4  ;;  %s470_s19 = smul.u32 (%p49_p3), 96, %s107_s17 }
   0xe   : > { %s112_s22 = scalar_lea.vmem (%p49_p3), %s611_s1, %s467_s18 }
   0xf   : > { %v125_v0 = vld [vmem:[%s112_s22] sm:$0xff] (%p49_p3)  ;;  %v127_v1 = vld [vmem:[%s112_s22 + $0x8] sm:$0xff] (%p49_p3)  ;;  %s109_s23 = scalar_lea.vmem (%p49_p3), [#allocation2], %s470_s19 }
  0x10   : > { %v129_v2 = vld [vmem:[%s112_s22 + $0x40] sm:$0xff] (%p49_p3)  ;;  %v131_v3 = vld [vmem:[%s112_s22 + $0x48] sm:$0xff] (%p49_p3)  ;;  %126 = vst [vmem:[%s109_s23] sm:$0xff] (%p49_p3), %v125_v0  ;;  %128 = vst [vmem:[%s109_s23 + $0x8] sm:$0xff] (%p49_p3), %v127_v1 }
  0x11   : > { %v133_v4 = vld [vmem:[%s112_s22 + $0x80] sm:$0xff]  ;;  %v135_v5 = vld [vmem:[%s112_s22 + $0x88] sm:$0xff]  ;;  %130 = vst [vmem:[%s109_s23 + $0x10] sm:$0xff] %v129_v2  ;;  %132 = vst [vmem:[%s109_s23 + $0x18] sm:$0xff] %v131_v3 }
  0x12   : > { %134 = vst [vmem:[%s109_s23 + $0x20] sm:$0xff] %v133_v4  ;;  %136 = vst [vmem:[%s109_s23 + $0x28] sm:$0xff] %v135_v5  ;;  %v137_v6 = vld [vmem:[%s112_s22 + $0xc0] sm:$0xff]  ;;  %v139_v7 = vld [vmem:[%s112_s22 + $0xc8] sm:$0xff] }
  0x13   : > { %v141_v8 = vld [vmem:[%s112_s22 + $0x100] sm:$0xff]  ;;  %138 = vst [vmem:[%s109_s23 + $0x30] sm:$0xff] %v137_v6  ;;  %140 = vst [vmem:[%s109_s23 + $0x38] sm:$0xff] %v139_v7  ;;  %v143_v9 = vld [vmem:[%s112_s22 + $0x108] sm:$0xff] }
  0x14   : > { %142 = vst [vmem:[%s109_s23 + $0x40] sm:$0xff] %v141_v8  ;;  %v145_v10 = vld [vmem:[%s112_s22 + $0x140] sm:$0xff]  ;;  %v147_v11 = vld [vmem:[%s112_s22 + $0x148] sm:$0xff]  ;;  %144 = vst [vmem:[%s109_s23 + $0x48] sm:$0xff] %v143_v9 }
  0x15   : > { %146 = vst [vmem:[%s109_s23 + $0x50] sm:$0xff] %v145_v10  ;;  %148 = vst [vmem:[%s109_s23 + $0x58] sm:$0xff] %v147_v11 }
  0x16 PF: > { %p446_p5 = scmp.ge.s32.totalorder %s537_s11, 1  ;;  %p153_p6 = scmp.lt.s32.totalorder %s537_s11, 5 }
  0x18   : > { %p154_p7 = pnand %p446_p5, %p153_p6 }
  0x19   : > { %s160_s24 = sand.u32 (!%p154_p7), 1, %s529_s9   ;;  %s447_s29 = sshll.u32 (!%p154_p7), %s440_s12, 2 }
  0x1a   : > { %157 = sbr.rel (%p154_p7) target bundleno = 246 (0xf6), region = 47  ;;  %p183_p8 = scmp.lt.s32.totalorder (!%p154_p7), %s447_s29, 15 }
  0x1b   : > { %s471_s25 = smul.u32 (!%p154_p7), 96, %s160_s24 }
  0x1d   : > { %s162_s26 = scalar_lea.vmem (!%p154_p7), [#allocation2], %s471_s25 }
  0x1f   : > { %v539_v12 = vmov 0   ;;  %v497_v13 = vld [vmem:[%s162_s26 + $0x44] ss:$16 sps:$4 sm:$0xff]   ;;  %v499_v14 = vld [vmem:[%s162_s26 + $0x4c] ss:$16 sps:$4 sm:$0xff]   ;;  %vm262_vm0 = vcmask 392192  }
  0x20   : > { %298 = vmatprep.mubr.bf16.mxu0 %v539_v12  ;;  %339 = vmatprep.mubr.bf16.mxu1 %v539_v12  ;;  %v501_v15 = vld [vmem:[%s162_s26 + $0x40] ss:$16 sps:$4 sm:$0xff]   ;;  %v502_v16 = vld [vmem:[%s162_s26 + $0x48] ss:$16 sps:$4 sm:$0xff]   ;;  %v503_v17 = vld [vmem:[%s162_s26 + $0x24] ss:$16 sps:$4 sm:$0xff]  }
  0x21   : > { %276 = vmatprep.subr.bf16.mxu0 %v497_v13  ;;  %317 = vmatprep.subr.bf16.mxu1 %v499_v14  ;;  %v505_v18 = vld [vmem:[%s162_s26 + $0x2c] ss:$16 sps:$4 sm:$0xff]   ;;  %v507_v19 = vld [vmem:[%s162_s26 + $0x20] ss:$16 sps:$4 sm:$0xff]   ;;  %v508_v20 = vld [vmem:[%s162_s26 + $0x28] ss:$16 sps:$4 sm:$0xff]  }
  0x22   : > { %277 = vmatpush1.bf16.msra.mxu0 %v501_v15  ;;  %318 = vmatpush1.bf16.msra.mxu1 %v502_v16  ;;  %v509_v21 = vld [vmem:[%s162_s26 + $0x4] ss:$16 sps:$4 sm:$0xff]   ;;  %v511_v22 = vld [vmem:[%s162_s26 + $0xc] ss:$16 sps:$4 sm:$0xff]   ;;  %v513_v23 = vld [vmem:[%s162_s26] ss:$16 sps:$4 sm:$0xff]  }
  0x23   : > { %278 = vmatprep.subr.bf16.mxu0 %v503_v17  ;;  %319 = vmatprep.subr.bf16.mxu1 %v505_v18  ;;  %v514_v24 = vld [vmem:[%s162_s26 + $0x8] ss:$16 sps:$4 sm:$0xff]   ;;  %v189_v25 = vld [vmem:[%s610_s0] sm:$0xf]  ;;  %s617_s29 = smov (!%p183_p8, %s447_s29), 15 }
  0x24   : > { %s448_s30 = sshll.u32 %s617_s29, 2 }
  0x25   : > { %s186_s5 = scalar_lea.vmem %s612_s2, %s448_s30 }
  0x26   : > { %279 = vmatpush1.bf16.msra.mxu0 %v507_v19  ;;  %320 = vmatpush1.bf16.msra.mxu1 %v508_v20 }
  0x27   : > { %280 = vmatprep.subr.bf16.mxu0 %v509_v21  ;;  %321 = vmatprep.subr.bf16.mxu1 %v511_v22 }
  0x2a   : > { %281 = vmatpush1.bf16.msra.mxu0 %v513_v23  ;;  %322 = vmatpush1.bf16.msra.mxu1 %v514_v24 }
  0x2d   : > { %461 = vmatmul.mubr.msk.bf16.vlgmr.msra.gmra.mxu0 %vm262_vm0, %v189_v25  ;;  %462 = vmatmul.mubr.msk.bf16.vlgmr.msra.gmra.mxu1 %vm262_vm0, %v189_v25 }
  0xed   : > { %v300_v26 = vpop.f32.mrf.mxu0  ;;  %v341_v27 = vpop.f32.mrf.mxu1 }
  0xee   : > { %v352_v28 = vmul.f32 0.2, %v300_v26  ;;  %vm348_vm1 = vcmp.gt.f32.partialorder %v300_v26, 0.0  ;;  %v354_v29 = vmul.f32 0.2, %v341_v27  ;;  %vm350_vm2 = vcmp.gt.f32.partialorder %v341_v27, 0.0 }
  0xef   : > { %v302_v30 = vpop.f32.mrf.mxu0  ;;  %v343_v31 = vpop.f32.mrf.mxu1 }
  0xf0   : > { %vm349_vm3 = vcmp.gt.f32.partialorder %v302_v30, 0.0  ;;  %v353_v32 = vmul.f32 0.2, %v302_v30  ;;  %vm351_vm4 = vcmp.gt.f32.partialorder %v343_v31, 0.0  ;;  %v355_v33 = vmul.f32 0.2, %v343_v31 }
  0xf1   : > { %v304_v34 = vpop.f32.mrf.mxu0  ;;  %v345_v35 = vpop.f32.mrf.mxu1  ;;  %v356_v36 = vsel %vm348_vm1, %v300_v26, %v352_v28  ;;  %v358_v38 = vsel %vm350_vm2, %v341_v27, %v354_v29 }
  0xf2   : > { %v357_v37 = vsel %vm349_vm3, %v302_v30, %v353_v32  ;;  %v359_v40 = vsel %vm351_vm4, %v343_v31, %v355_v33 }
  0xf3   : > { %v468_v39 = vpack.c.bf16 %v357_v37, %v356_v36  ;;  %v305_v41 = vpop.f32.mrf.mxu0  ;;  %v346_v42 = vpop.f32.mrf.mxu1  ;;  %v469_v43 = vpack.c.bf16 %v359_v40, %v358_v38 }
  0xf5   : > { %376 = vst [vmem:[%s186_s5] sm:$0xff] %v468_v39  ;;  %377 = vst [vmem:[%s186_s5 + $0x8] sm:$0xff] %v469_v43 }
  0xf6 PF: > { %p9_p9 = scmp.ge.s32.totalorder %s572_s13, 6   ;;  %s613_s9 = smov %s533_s10 }
  0xf7   : > { %s614_s10 = smov %s581_s16  ;;  %s615_s11 = smov %s572_s13 }
  0xf8   :  { %11 = sbr.rel (!%p9_p9) target bundleno = 2 (0x2), region = 86 }

// kernel: discriminator_forward.10
= control target key start
LH: loop header
LB: loop body
LE: loop exit
PB: predicated region body
PF: predicated region fallthrough
CT: control target
= control target key end

     0   :  { %v124_v0 = vmov 1   ;;  %v125_v1 = vmov 0   ;;  %s183_s0 = inlined_call_operand.vmem [shape: f32[16,2], index: 0, kind: input, shape index: {}]   ;;  %s184_s1 = inlined_call_operand.vmem [shape: f32[16,512], index: 1, kind: input, shape index: {}]   ;;  %s185_s2 = inlined_call_operand.vmem [shape: bf16[16,512], index: 2, kind: output, shape index: {}]  }
   0x1   :  { %122 = vset.pattern.permute.xlu1 %v124_v0  ;;  %121 = vset.pattern.permute.xlu0 %v125_v1  ;;  %v19_v2 = vld [vmem:[%s183_s0] sm:$0xff]  ;;  %v20_v3 = vld [vmem:[%s183_s0 + $0x8] sm:$0xff]  ;;  %v13_v6 = vld [vmem:[%s184_s1 + $0x10] sm:$0xff] }
   0x2   :  { %40 = vperm.xlu1 %122, %v19_v2   ;;  %23 = vperm.xlu0 %121, %v19_v2   ;;  %v11_v4 = vld [vmem:[%s184_s1] sm:$0xff]  ;;  %v12_v5 = vld [vmem:[%s184_s1 + $0x8] sm:$0xff]  ;;  %v14_v7 = vld [vmem:[%s184_s1 + $0x18] sm:$0xff] }
   0x3   :  { %v15_v18 = vld [vmem:[%s184_s1 + $0x20] sm:$0xff]  ;;  %v16_v19 = vld [vmem:[%s184_s1 + $0x28] sm:$0xff]  ;;  %v17_v20 = vld [vmem:[%s184_s1 + $0x30] sm:$0xff] }
   0x4   :  { %v18_v21 = vld [vmem:[%s184_s1 + $0x38] sm:$0xff] }
   0x6   :  { %44 = vperm.xlu1 %122, %v20_v3   ;;  %28 = vperm.xlu0 %121, %v20_v3  }
   0xa   :  { %123 = vset.pattern.permute.xlu0 %v124_v0 }
  0x7d   :  { %v24_v8 = vpop.permute.xlu0 %23  ;;  %v41_v9 = vpop.permute.xlu1 %40 }
  0x7e   :  { %v31_v10 = vsub.f32 %v11_v4, %v24_v8  ;;  %v32_v11 = vsub.f32 %v12_v5, %v24_v8  ;;  %v33_v12 = vsub.f32 %v13_v6, %v24_v8  ;;  %v34_v13 = vsub.f32 %v14_v7, %v24_v8 }
  0x80   :  { %v47_v14 = vmul.f32 %v41_v9, %v31_v10  ;;  %v48_v15 = vmul.f32 %v41_v9, %v32_v11  ;;  %v49_v16 = vmul.f32 %v41_v9, %v33_v12  ;;  %v50_v17 = vmul.f32 %v41_v9, %v34_v13 }
  0x81   :  { %v29_v22 = vpop.permute.xlu0 %28  ;;  %v45_v28 = vpop.permute.xlu1 %44 }
  0x82   :  { %vm55_vm0 = vcmp.gt.f32.partialorder %v47_v14, 0.0  ;;  %vm56_vm1 = vcmp.gt.f32.partialorder %v48_v15, 0.0  ;;  %vm57_vm2 = vcmp.gt.f32.partialorder %v49_v16, 0.0  ;;  %vm58_vm3 = vcmp.gt.f32.partialorder %v50_v17, 0.0 }
  0x83   :  { %v63_v23 = vmul.f32 0.2, %v47_v14  ;;  %v64_v24 = vmul.f32 0.2, %v48_v15  ;;  %v65_v25 = vmul.f32 0.2, %v49_v16  ;;  %v35_v26 = vsub.f32 %v15_v18, %v29_v22 }
  0x84   :  { %v66_v27 = vmul.f32 0.2, %v50_v17  ;;  %v36_v29 = vsub.f32 %v16_v19, %v29_v22  ;;  %v37_v30 = vsub.f32 %v17_v20, %v29_v22  ;;  %v38_v31 = vsub.f32 %v18_v21, %v29_v22 }
  0x85   :  { %v71_v32 = vsel %vm55_vm0, %v47_v14, %v63_v23  ;;  %v72_v33 = vsel %vm56_vm1, %v48_v15, %v64_v24  ;;  %v73_v34 = vsel %vm57_vm2, %v49_v16, %v65_v25  ;;  %v51_v35 = vmul.f32 %v45_v28, %v35_v26 }
  0x86   :  { %v74_v36 = vsel %vm58_vm3, %v50_v17, %v66_v27  ;;  %v115_v37 = vpack.c.bf16 %v72_v33, %v71_v32  ;;  %v52_v38 = vmul.f32 %v45_v28, %v36_v29  ;;  %v53_v39 = vmul.f32 %v45_v28, %v37_v30 }
  0x87   :  { %v116_v40 = vpack.c.bf16 %v74_v36, %v73_v34  ;;  %v54_v41 = vmul.f32 %v45_v28, %v38_v31  ;;  %vm59_vm4 = vcmp.gt.f32.partialorder %v51_v35, 0.0  ;;  %v67_v42 = vmul.f32 0.2, %v51_v35 }
  0x88   :  { %103 = vst [vmem:[%s185_s2] sm:$0xff] %v115_v37  ;;  %vm60_vm5 = vcmp.gt.f32.partialorder %v52_v38, 0.0  ;;  %vm61_vm6 = vcmp.gt.f32.partialorder %v53_v39, 0.0  ;;  %v68_v43 = vmul.f32 0.2, %v52_v38  ;;  %v69_v44 = vmul.f32 0.2, %v53_v39 }
  0x89   :  { %104 = vst [vmem:[%s185_s2 + $0x8] sm:$0xff] %v116_v40  ;;  %vm62_vm7 = vcmp.gt.f32.partialorder %v54_v41, 0.0  ;;  %v70_v45 = vmul.f32 0.2, %v54_v41  ;;  %v75_v46 = vsel %vm59_vm4, %v51_v35, %v67_v42 }
  0x8a   :  { %v76_v47 = vsel %vm60_vm5, %v52_v38, %v68_v43  ;;  %v77_v48 = vsel %vm61_vm6, %v53_v39, %v69_v44 }
  0x8b   :  { %v78_v49 = vsel %vm62_vm7, %v54_v41, %v70_v45  ;;  %v117_v50 = vpack.c.bf16 %v76_v47, %v75_v46 }
  0x8c   :  { %v118_v51 = vpack.c.bf16 %v78_v49, %v77_v48 }
  0x8d   :  { %105 = vst [vmem:[%s185_s2 + $0x10] sm:$0xff] %v117_v50 }
  0x8e   :  { %106 = vst [vmem:[%s185_s2 + $0x18] sm:$0xff] %v118_v51 }

// kernel: discriminator_forward.9
= control target key start
LH: loop header
LB: loop body
LE: loop exit
PB: predicated region body
PF: predicated region fallthrough
CT: control target
= control target key end

     0   :  { %v433_v1 = vmov 0   ;;  %vm336_vm0 = vcmask 7168   ;;  %vm339_vm1 = vcmask 15368   ;;  %s589_s1 = inlined_call_operand.vmem [shape: bf16[128,512], index: 1, kind: input, shape index: {}]   ;;  %s590_s0 = inlined_call_operand.vmem [shape: bf16[16,128], index: 0, kind: input, shape index: {}]   ;;  %s591_s2 = inlined_call_operand.vmem [shape: f32[16,512], index: 2, kind: output, shape index: {0}]   ;;  %s592_s3 = inlined_call_operand.vmem [shape: f32[1,16,2], index: 3, kind: output, shape index: {1}]  }
   0x1   :  { %v384_v0 = vld [vmem:[%s589_s1 + $0xe4] ss:$16 sps:$4 sm:$0xff]   ;;  %246 = vmatprep.mubr.bf16.mxu0 %v433_v1  ;;  %289 = vmatprep.mubr.bf16.mxu1 %v433_v1  ;;  %v386_v2 = vld [vmem:[%s589_s1 + $0xec] ss:$16 sps:$4 sm:$0xff]   ;;  %v388_v3 = vld [vmem:[%s589_s1 + $0xe0] ss:$16 sps:$4 sm:$0xff]  }
   0x2   :  { %214 = vmatprep.subr.bf16.mxu0 %v384_v0  ;;  %v389_v4 = vld [vmem:[%s589_s1 + $0xe8] ss:$16 sps:$4 sm:$0xff]   ;;  %257 = vmatprep.subr.bf16.mxu1 %v386_v2  ;;  %v390_v5 = vld [vmem:[%s589_s1 + $0xc4] ss:$16 sps:$4 sm:$0xff]   ;;  %v392_v6 = vld [vmem:[%s589_s1 + $0xcc] ss:$16 sps:$4 sm:$0xff]  }
   0x3   :  { %215 = vmatpush1.bf16.msra.mxu0 %v388_v3  ;;  %258 = vmatpush1.bf16.msra.mxu1 %v389_v4  ;;  %v394_v7 = vld [vmem:[%s589_s1 + $0xc0] ss:$16 sps:$4 sm:$0xff]   ;;  %v395_v8 = vld [vmem:[%s589_s1 + $0xc8] ss:$16 sps:$4 sm:$0xff]   ;;  %v396_v9 = vld [vmem:[%s589_s1 + $0xa4] ss:$16 sps:$4 sm:$0xff]  }
   0x4   :  { %216 = vmatprep.subr.bf16.mxu0 %v390_v5  ;;  %259 = vmatprep.subr.bf16.mxu1 %v392_v6  ;;  %v398_v10 = vld [vmem:[%s589_s1 + $0xac] ss:$16 sps:$4 sm:$0xff]   ;;  %v400_v11 = vld [vmem:[%s589_s1 + $0xa0] ss:$16 sps:$4 sm:$0xff]   ;;  %v401_v12 = vld [vmem:[%s589_s1 + $0xa8] ss:$16 sps:$4 sm:$0xff]  }
   0x5   :  { %v402_v13 = vld [vmem:[%s589_s1 + $0x84] ss:$16 sps:$4 sm:$0xff]   ;;  %v404_v14 = vld [vmem:[%s589_s1 + $0x8c] ss:$16 sps:$4 sm:$0xff]   ;;  %v406_v15 = vld [vmem:[%s589_s1 + $0x80] ss:$16 sps:$4 sm:$0xff]  }
   0x6   :  { %v407_v16 = vld [vmem:[%s589_s1 + $0x88] ss:$16 sps:$4 sm:$0xff]   ;;  %v408_v17 = vld [vmem:[%s589_s1 + $0x64] ss:$16 sps:$4 sm:$0xff]   ;;  %v410_v18 = vld [vmem:[%s589_s1 + $0x6c] ss:$16 sps:$4 sm:$0xff]  }
   0x7   :  { %217 = vmatpush1.bf16.msra.mxu0 %v394_v7  ;;  %260 = vmatpush1.bf16.msra.mxu1 %v395_v8  ;;  %v412_v19 = vld [vmem:[%s589_s1 + $0x60] ss:$16 sps:$4 sm:$0xff]   ;;  %v413_v20 = vld [vmem:[%s589_s1 + $0x68] ss:$16 sps:$4 sm:$0xff]   ;;  %v414_v21 = vld [vmem:[%s589_s1 + $0x44] ss:$16 sps:$4 sm:$0xff]  }
   0x8   :  { %218 = vmatprep.subr.bf16.mxu0 %v396_v9  ;;  %261 = vmatprep.subr.bf16.mxu1 %v398_v10  ;;  %v416_v22 = vld [vmem:[%s589_s1 + $0x4c] ss:$16 sps:$4 sm:$0xff]   ;;  %v418_v23 = vld [vmem:[%s589_s1 + $0x40] ss:$16 sps:$4 sm:$0xff]   ;;  %v419_v24 = vld [vmem:[%s589_s1 + $0x48] ss:$16 sps:$4 sm:$0xff]  }
   0x9   :  { %v420_v25 = vld [vmem:[%s589_s1 + $0x24] ss:$16 sps:$4 sm:$0xff]   ;;  %v422_v26 = vld [vmem:[%s589_s1 + $0x2c] ss:$16 sps:$4 sm:$0xff]   ;;  %v424_v27 = vld [vmem:[%s589_s1 + $0x20] ss:$16 sps:$4 sm:$0xff]  }
   0xa   :  { %v425_v28 = vld [vmem:[%s589_s1 + $0x28] ss:$16 sps:$4 sm:$0xff]   ;;  %v426_v29 = vld [vmem:[%s589_s1 + $0x4] ss:$16 sps:$4 sm:$0xff]   ;;  %v428_v30 = vld [vmem:[%s589_s1 + $0xc] ss:$16 sps:$4 sm:$0xff]  }
   0xb   :  { %219 = vmatpush1.bf16.msra.mxu0 %v400_v11  ;;  %262 = vmatpush1.bf16.msra.mxu1 %v401_v12  ;;  %v430_v31 = vld [vmem:[%s589_s1] ss:$16 sps:$4 sm:$0xff]   ;;  %v431_v32 = vld [vmem:[%s589_s1 + $0x8] ss:$16 sps:$4 sm:$0xff]  }
   0xc   :  { %220 = vmatprep.subr.bf16.mxu0 %v402_v13  ;;  %263 = vmatprep.subr.bf16.mxu1 %v404_v14  ;;  %v432_v33 = vld [vmem:[%s590_s0] sm:$0xff]  }
   0xf   :  { %221 = vmatpush1.bf16.msra.mxu0 %v406_v15  ;;  %264 = vmatpush1.bf16.msra.mxu1 %v407_v16 }
  0x10   :  { %222 = vmatprep.subr.bf16.mxu0 %v408_v17  ;;  %265 = vmatprep.subr.bf16.mxu1 %v410_v18 }
  0x13   :  { %223 = vmatpush1.bf16.msra.mxu0 %v412_v19  ;;  %266 = vmatpush1.bf16.msra.mxu1 %v413_v20 }
  0x14   :  { %224 = vmatprep.subr.bf16.mxu0 %v414_v21  ;;  %267 = vmatprep.subr.bf16.mxu1 %v416_v22 }
  0x17   :  { %225 = vmatpush1.bf16.msra.mxu0 %v418_v23  ;;  %268 = vmatpush1.bf16.msra.mxu1 %v419_v24 }
  0x18   :  { %226 = vmatprep.subr.bf16.mxu0 %v420_v25  ;;  %269 = vmatprep.subr.bf16.mxu1 %v422_v26 }
  0x1b   :  { %227 = vmatpush1.bf16.msra.mxu0 %v424_v27  ;;  %270 = vmatpush1.bf16.msra.mxu1 %v425_v28 }
  0x1c   :  { %228 = vmatprep.subr.bf16.mxu0 %v426_v29  ;;  %271 = vmatprep.subr.bf16.mxu1 %v428_v30 }
  0x1f   :  { %229 = vmatpush1.bf16.msra.mxu0 %v430_v31  ;;  %272 = vmatpush1.bf16.msra.mxu1 %v431_v32 }
  0x22   :  { %247 = vmatmul.mubr.bf16.vlgmr.msra.gmra.mxu0 %v432_v33  ;;  %290 = vmatmul.mubr.bf16.vlgmr.msra.gmra.mxu1 %v432_v33 }
  0xe2   :  { %v248_v34 = vpop.f32.mrf.mxu0  ;;  %v291_v35 = vpop.f32.mrf.mxu1 }
  0xe3   :  { %300 = vst [vmem:[%s591_s2] sm:$0xff] %v248_v34  ;;  %302 = vst [vmem:[%s591_s2 + $0x10] sm:$0xff] %v291_v35  ;;  %v318_v38 = vmul.f32 %v248_v34, %v248_v34  ;;  %v320_v41 = vmul.f32 %v291_v35, %v291_v35 }
  0xe4   :  { %v250_v36 = vpop.f32.mrf.mxu0  ;;  %v293_v37 = vpop.f32.mrf.mxu1 }
  0xe5   :  { %301 = vst [vmem:[%s591_s2 + $0x8] sm:$0xff] %v250_v36  ;;  %v308_v39 = vadd.f32 %v250_v36, %v248_v34  ;;  %v319_v40 = vmul.f32 %v250_v36, %v250_v36  ;;  %303 = vst [vmem:[%s591_s2 + $0x18] sm:$0xff] %v293_v37  ;;  %v321_v52 = vmul.f32 %v293_v37, %v293_v37 }
  0xe6   :  { %v252_v42 = vpop.f32.mrf.mxu0  ;;  %v295_v43 = vpop.f32.mrf.mxu1 }
  0xe7   :  { %304 = vst [vmem:[%s591_s2 + $0x20] sm:$0xff] %v252_v42  ;;  %306 = vst [vmem:[%s591_s2 + $0x30] sm:$0xff] %v295_v43  ;;  %v309_v44 = vadd.f32 %v308_v39, %v291_v35  ;;  %v326_v45 = vadd.f32 %v319_v40, %v318_v38  ;;  %v322_v48 = vmul.f32 %v252_v42, %v252_v42 }
  0xe8   :  { %v254_v46 = vpop.f32.mrf.mxu0  ;;  %v297_v47 = vpop.f32.mrf.mxu1  ;;  %v324_v54 = vmul.f32 %v295_v43, %v295_v43 }
  0xe9   :  { %305 = vst [vmem:[%s591_s2 + $0x28] sm:$0xff] %v254_v46  ;;  %v313_v49 = vadd.f32 %v254_v46, %v252_v42  ;;  %v323_v50 = vmul.f32 %v254_v46, %v254_v46  ;;  %307 = vst [vmem:[%s591_s2 + $0x38] sm:$0xff] %v297_v47  ;;  %v310_v51 = vadd.f32 %v309_v44, %v293_v37 }
  0xea   :  { %v327_v53 = vadd.f32 %v326_v45, %v320_v41  ;;  %v325_v58 = vmul.f32 %v297_v47, %v297_v47 }
  0xeb   :  { %v331_v55 = vadd.f32 %v323_v50, %v322_v48  ;;  %311 = vadd.xlane.f32.xlu0 %v310_v51  ;;  %v314_v56 = vadd.f32 %v313_v49, %v295_v43 }
  0xec   :  { %v328_v57 = vadd.f32 %v327_v53, %v321_v52 }
  0xed   :  { %v315_v59 = vadd.f32 %v314_v56, %v297_v47  ;;  %v332_v60 = vadd.f32 %v331_v55, %v324_v54 }
  0xee   :  { %329 = vadd.xlane.f32.xlu1 %v328_v57 }
  0xef   :  { %316 = vadd.xlane.f32.xlu0 %v315_v59  ;;  %v333_v61 = vadd.f32 %v332_v60, %v325_v58 }
  0xf2   :  { %334 = vadd.xlane.f32.xlu1 %v333_v61 }
 0x174   :  { %v312_v62 = vpop.xlane.xlu0 %311 }
 0x175   :  { %337 = vst.msk [vmem:[%s592_s3] sm:$0xff] %vm336_vm0, %v312_v62 }
 0x177   :  { %v330_v63 = vpop.xlane.xlu1 %329 }
 0x178   :  { %340 = vst.msk [vmem:[%s592_s3] sm:$0xff] %vm339_vm1, %v330_v63  ;;  %v317_v0 = vpop.xlane.xlu0 %316 }
 0x179   :  { %338 = vst.msk [vmem:[%s592_s3 + $0x8] sm:$0xff] %vm336_vm0, %v317_v0 }
 0x17b   :  { %v335_v1 = vpop.xlane.xlu1 %334 }
 0x17c   :  { %341 = vst.msk [vmem:[%s592_s3 + $0x8] sm:$0xff] %vm339_vm1, %v335_v1 }

// kernel: discriminator_forward.11
= control target key start
LH: loop header
LB: loop body
LE: loop exit
PB: predicated region body
PF: predicated region fallthrough
CT: control target
= control target key end

     0   :  { %vm239_vm0 = vcmask 7168   ;;  %vm244_vm1 = vcmask 15368   ;;  %s459_s1 = inlined_call_operand.vmem [shape: bf16[256,128], index: 1, kind: input, shape index: {}]   ;;  %s460_s0 = inlined_call_operand.vmem [shape: bf16[32,256], index: 0, kind: input, shape index: {}]   ;;  %s461_s2 = inlined_call_operand.vmem [shape: f32[32,128], index: 2, kind: output, shape index: {0}]   ;;  %s462_s3 = inlined_call_operand.vmem [shape: f32[1,32,2], index: 3, kind: output, shape index: {1}]  }
   0x1   :  { %v321_v0 = vld [vmem:[%s459_s1 + $0x78] sm:$0xff]   ;;  %v323_v2 = vld [vmem:[%s459_s1 + $0x70] sm:$0xff]   ;;  %v325_v4 = vld [vmem:[%s459_s1 + $0x68] sm:$0xff]  }
   0x2   :  { %v322_v1 = vld [vmem:[%s459_s1 + $0x38] sm:$0xff]   ;;  %277 = vmatprep.subr.bf16.mxu0 %v321_v0  ;;  %305 = vmatprep.subr.bf16.mxu1 %v321_v0  ;;  %v324_v3 = vld [vmem:[%s459_s1 + $0x30] sm:$0xff]   ;;  %v326_v5 = vld [vmem:[%s459_s1 + $0x28] sm:$0xff]  }
   0x3   :  { %278 = vmatpush3.bf16.msra.mxu0 %v322_v1  ;;  %313 = vmatpush3.bf16.msra.mxu1 %v322_v1  ;;  %v327_v6 = vld [vmem:[%s459_s1 + $0x60] sm:$0xff]   ;;  %v329_v8 = vld [vmem:[%s459_s1 + $0x58] sm:$0xff]   ;;  %v331_v10 = vld [vmem:[%s459_s1 + $0x50] sm:$0xff]  }
   0x4   :  { %279 = vmatprep.subr.bf16.mxu0 %v323_v2  ;;  %306 = vmatprep.subr.bf16.mxu1 %v323_v2  ;;  %v328_v7 = vld [vmem:[%s459_s1 + $0x20] sm:$0xff]   ;;  %v330_v9 = vld [vmem:[%s459_s1 + $0x18] sm:$0xff]   ;;  %v332_v13 = vld [vmem:[%s459_s1 + $0x10] sm:$0xff]  }
   0x5   :  { %v339_v11 = vld [vmem:[%s460_s0 + $0x4] ss:$8 sps:$4 sm:$0xff]   ;;  %v342_v12 = vld [vmem:[%s460_s0 + $0x14] ss:$8 sps:$4 sm:$0xff]   ;;  %v337_v18 = vld [vmem:[%s460_s0] ss:$8 sps:$4 sm:$0xff]  }
   0x6   :  { %v333_v14 = vld [vmem:[%s459_s1 + $0x48] sm:$0xff]   ;;  %198 = vmatprep.mubr.bf16.mxu0 %v339_v11  ;;  %206 = vmatprep.mubr.bf16.mxu1 %v342_v12  ;;  %v335_v16 = vld [vmem:[%s459_s1 + $0x40] sm:$0xff]   ;;  %v340_v19 = vld [vmem:[%s460_s0 + $0x10] ss:$8 sps:$4 sm:$0xff]  }
   0x7   :  { %280 = vmatpush3.bf16.msra.mxu0 %v324_v3  ;;  %314 = vmatpush3.bf16.msra.mxu1 %v324_v3  ;;  %v334_v15 = vld [vmem:[%s459_s1 + $0x8] sm:$0xff]   ;;  %v336_v17 = vld [vmem:[%s459_s1] sm:$0xff]  }
   0x8   :  { %281 = vmatprep.subr.bf16.mxu0 %v325_v4  ;;  %307 = vmatprep.subr.bf16.mxu1 %v325_v4 }
   0xb   :  { %282 = vmatpush3.bf16.msra.mxu0 %v326_v5  ;;  %315 = vmatpush3.bf16.msra.mxu1 %v326_v5 }
   0xc   :  { %283 = vmatprep.subr.bf16.mxu0 %v327_v6  ;;  %308 = vmatprep.subr.bf16.mxu1 %v327_v6 }
   0xf   :  { %284 = vmatpush3.bf16.msra.mxu0 %v328_v7  ;;  %316 = vmatpush3.bf16.msra.mxu1 %v328_v7 }
  0x10   :  { %285 = vmatprep.subr.bf16.mxu0 %v329_v8  ;;  %309 = vmatprep.subr.bf16.mxu1 %v329_v8 }
  0x13   :  { %286 = vmatpush3.bf16.msra.mxu0 %v330_v9  ;;  %317 = vmatpush3.bf16.msra.mxu1 %v330_v9 }
  0x14   :  { %287 = vmatprep.subr.bf16.mxu0 %v331_v10  ;;  %310 = vmatprep.subr.bf16.mxu1 %v331_v10 }
  0x17   :  { %288 = vmatpush3.bf16.msra.mxu0 %v332_v13  ;;  %318 = vmatpush3.bf16.msra.mxu1 %v332_v13 }
  0x18   :  { %289 = vmatprep.subr.bf16.mxu0 %v333_v14  ;;  %311 = vmatprep.subr.bf16.mxu1 %v333_v14 }
  0x1b   :  { %290 = vmatpush3.bf16.msra.mxu0 %v334_v15  ;;  %319 = vmatpush3.bf16.msra.mxu1 %v334_v15 }
  0x1c   :  { %291 = vmatprep.subr.bf16.mxu0 %v335_v16  ;;  %312 = vmatprep.subr.bf16.mxu1 %v335_v16 }
  0x1f   :  { %292 = vmatpush3.bf16.msra.mxu0 %v336_v17  ;;  %320 = vmatpush3.bf16.msra.mxu1 %v336_v17 }
  0x22   :  { %199 = vmatmul.mubr.bf16.vlgmr.msra.gmra.mxu0 %v337_v18  ;;  %207 = vmatmul.mubr.bf16.vlgmr.msra.gmra.mxu1 %v340_v19 }
  0xe2   :  { %v293_v20 = vpop.f32.mrf.mxu0  ;;  %v299_v21 = vpop.f32.mrf.mxu1 }
  0xe4   :  { %v294_v22 = vpop.f32.mrf.mxu0  ;;  %v300_v23 = vpop.f32.mrf.mxu1 }
  0xe5   :  { %v295_v24 = vadd.f32 %v294_v22, %v293_v20  ;;  %v301_v25 = vadd.f32 %v300_v23, %v299_v21 }
  0xe6   :  { %v296_v26 = vpop.f32.mrf.mxu0  ;;  %v302_v27 = vpop.f32.mrf.mxu1 }
  0xe7   :  { %215 = vst [vmem:[%s461_s2] sm:$0xff] %v295_v24  ;;  %217 = vst [vmem:[%s461_s2 + $0x10] sm:$0xff] %v301_v25  ;;  %223 = vadd.xlane.f32.xlu1 %v301_v25  ;;  %219 = vadd.xlane.f32.xlu0 %v295_v24  ;;  %v227_v32 = vmul.f32 %v295_v24, %v295_v24  ;;  %v229_v35 = vmul.f32 %v301_v25, %v301_v25 }
  0xe8   :  { %v297_v28 = vpop.f32.mrf.mxu0  ;;  %v303_v29 = vpop.f32.mrf.mxu1 }
  0xe9   :  { %v298_v30 = vadd.f32 %v297_v28, %v296_v26  ;;  %v304_v31 = vadd.f32 %v303_v29, %v302_v27 }
  0xeb   :  { %216 = vst [vmem:[%s461_s2 + $0x8] sm:$0xff] %v298_v30  ;;  %218 = vst [vmem:[%s461_s2 + $0x18] sm:$0xff] %v304_v31  ;;  %225 = vadd.xlane.f32.xlu1 %v304_v31  ;;  %231 = vadd.xlane.f32.xlu0 %v227_v32  ;;  %v228_v33 = vmul.f32 %v298_v30, %v298_v30  ;;  %v230_v34 = vmul.f32 %v304_v31, %v304_v31 }
  0xef   :  { %233 = vadd.xlane.f32.xlu1 %v228_v33  ;;  %221 = vadd.xlane.f32.xlu0 %v298_v30 }
  0xf3   :  { %237 = vadd.xlane.f32.xlu1 %v230_v34  ;;  %235 = vadd.xlane.f32.xlu0 %v229_v35 }
 0x170   :  { %v224_v36 = vpop.xlane.xlu1 %223  ;;  %v220_v37 = vpop.xlane.xlu0 %219 }
 0x171   :  { %242 = vst.msk [vmem:[%s462_s3 + $0x10] sm:$0xff] %vm239_vm0, %v224_v36  ;;  %240 = vst.msk [vmem:[%s462_s3] sm:$0xff] %vm239_vm0, %v220_v37 }
 0x174   :  { %v226_v38 = vpop.xlane.xlu1 %225  ;;  %v232_v39 = vpop.xlane.xlu0 %231 }
 0x175   :  { %243 = vst.msk [vmem:[%s462_s3 + $0x18] sm:$0xff] %vm239_vm0, %v226_v38 }
 0x176   :  { %245 = vst.msk [vmem:[%s462_s3] sm:$0xff] %vm244_vm1, %v232_v39 }
 0x178   :  { %v234_v40 = vpop.xlane.xlu1 %233  ;;  %v222_v41 = vpop.xlane.xlu0 %221 }
 0x179   :  { %241 = vst.msk [vmem:[%s462_s3 + $0x8] sm:$0xff] %vm239_vm0, %v222_v41 }
 0x17a   :  { %246 = vst.msk [vmem:[%s462_s3 + $0x8] sm:$0xff] %vm244_vm1, %v234_v40 }
 0x17c   :  { %v238_v42 = vpop.xlane.xlu1 %237  ;;  %v236_v43 = vpop.xlane.xlu0 %235 }
 0x17d   :  { %248 = vst.msk [vmem:[%s462_s3 + $0x18] sm:$0xff] %vm244_vm1, %v238_v42  ;;  %247 = vst.msk [vmem:[%s462_s3 + $0x10] sm:$0xff] %vm244_vm1, %v236_v43 }

// kernel: discriminator_forward.12
= control target key start
LH: loop header
LB: loop body
LE: loop exit
PB: predicated region body
PF: predicated region fallthrough
CT: control target
= control target key end

     0   :  { %v124_v0 = vmov 0   ;;  %v125_v5 = vmov 1   ;;  %s171_s0 = inlined_call_operand.vmem [shape: f32[32,2], index: 0, kind: input, shape index: {}]   ;;  %s172_s1 = inlined_call_operand.vmem [shape: f32[32,128], index: 1, kind: input, shape index: {}]   ;;  %s173_s2 = inlined_call_operand.vmem [shape: bf16[32,128], index: 2, kind: output, shape index: {}]  }
   0x1   :  { %121 = vset.pattern.permute.xlu1 %v124_v0  ;;  %120 = vset.pattern.permute.xlu0 %v124_v0  ;;  %v17_v1 = vld [vmem:[%s171_s0 + $0x10] sm:$0xff]  ;;  %v15_v2 = vld [vmem:[%s171_s0] sm:$0xff]  ;;  %v18_v3 = vld [vmem:[%s171_s0 + $0x18] sm:$0xff] }
   0x2   :  { %31 = vperm.xlu1 %121, %v17_v1   ;;  %21 = vperm.xlu0 %120, %v15_v2   ;;  %v16_v4 = vld [vmem:[%s171_s0 + $0x8] sm:$0xff]  ;;  %v11_v10 = vld [vmem:[%s172_s1] sm:$0xff]  ;;  %v13_v12 = vld [vmem:[%s172_s1 + $0x10] sm:$0xff] }
   0x3   :  { %v12_v11 = vld [vmem:[%s172_s1 + $0x8] sm:$0xff]  ;;  %v14_v14 = vld [vmem:[%s172_s1 + $0x18] sm:$0xff] }
   0x6   :  { %36 = vperm.xlu1 %121, %v18_v3   ;;  %26 = vperm.xlu0 %120, %v16_v4  }
   0xa   :  { %123 = vset.pattern.permute.xlu1 %v125_v5  ;;  %122 = vset.pattern.permute.xlu0 %v125_v5 }
   0xb   :  { %48 = vperm.xlu1 %123, %v16_v4   ;;  %44 = vperm.xlu0 %122, %v15_v2  }
   0xf   :  { %52 = vperm.xlu1 %123, %v17_v1   ;;  %56 = vperm.xlu0 %122, %v18_v3  }
  0x7d   :  { %v32_v6 = vpop.permute.xlu1 %31  ;;  %v22_v7 = vpop.permute.xlu0 %21 }
  0x7e   :  { %v39_v13 = vsub.f32 %v11_v10, %v22_v7  ;;  %v41_v20 = vsub.f32 %v13_v12, %v32_v6 }
  0x81   :  { %v37_v8 = vpop.permute.xlu1 %36  ;;  %v27_v9 = vpop.permute.xlu0 %26 }
  0x82   :  { %v40_v15 = vsub.f32 %v12_v11, %v27_v9  ;;  %v42_v21 = vsub.f32 %v14_v14, %v37_v8 }
  0x86   :  { %v49_v16 = vpop.permute.xlu1 %48  ;;  %v45_v17 = vpop.permute.xlu0 %44 }
  0x87   :  { %v60_v18 = vmul.f32 %v49_v16, %v40_v15  ;;  %v59_v19 = vmul.f32 %v45_v17, %v39_v13 }
  0x89   :  { %vm64_vm0 = vcmp.gt.f32.partialorder %v60_v18, 0.0  ;;  %v68_v22 = vmul.f32 0.2, %v60_v18  ;;  %vm63_vm1 = vcmp.gt.f32.partialorder %v59_v19, 0.0  ;;  %v67_v23 = vmul.f32 0.2, %v59_v19 }
  0x8a   :  { %v53_v24 = vpop.permute.xlu1 %52  ;;  %v57_v25 = vpop.permute.xlu0 %56 }
  0x8b   :  { %v72_v26 = vsel %vm64_vm0, %v60_v18, %v68_v22  ;;  %v71_v27 = vsel %vm63_vm1, %v59_v19, %v67_v23  ;;  %v61_v28 = vmul.f32 %v53_v24, %v41_v20  ;;  %v62_v29 = vmul.f32 %v57_v25, %v42_v21 }
  0x8c   :  { %v110_v30 = vpack.c.bf16 %v72_v26, %v71_v27 }
  0x8d   :  { %vm65_vm2 = vcmp.gt.f32.partialorder %v61_v28, 0.0  ;;  %v69_v31 = vmul.f32 0.2, %v61_v28  ;;  %vm66_vm3 = vcmp.gt.f32.partialorder %v62_v29, 0.0  ;;  %v70_v32 = vmul.f32 0.2, %v62_v29 }
  0x8e   :  { %111 = vst [vmem:[%s173_s2] sm:$0xff] %v110_v30  }
  0x8f   :  { %v73_v33 = vsel %vm65_vm2, %v61_v28, %v69_v31  ;;  %v74_v34 = vsel %vm66_vm3, %v62_v29, %v70_v32 }
  0x90   :  { %v115_v35 = vpack.c.bf16 %v74_v34, %v73_v33 }
  0x92   :  { %117 = vst [vmem:[%s173_s2 + $0x8] sm:$0xff] %v115_v35  }

// kernel: discriminator_forward.13
= control target key start
LH: loop header
LB: loop body
LE: loop exit
PB: predicated region body
PF: predicated region fallthrough
CT: control target
= control target key end

     0   :  { %vm496_vm0 = vcmask 261120   ;;  %vm561_vm1 = vcmask 7168   ;;  %vm570_vm2 = vcmask 15368   ;;  %s1047_s1 = inlined_call_operand.vmem [shape: bf16[512,32], index: 1, kind: input, shape index: {}]   ;;  %s1048_s0 = inlined_call_operand.vmem [shape: bf16[64,512], index: 0, kind: input, shape index: {}]   ;;  %s1049_s2 = inlined_call_operand.vmem [shape: f32[64,32], index: 2, kind: output, shape index: {0}]   ;;  %s1050_s3 = inlined_call_operand.vmem [shape: f32[1,64,2], index: 3, kind: output, shape index: {1}]  }
   0x1   :  { %v715_v0 = vld [vmem:[%s1047_s1 + $0x78] sm:$0xff]   ;;  %v719_v4 = vld [vmem:[%s1047_s1 + $0x70] sm:$0xff]   ;;  %v723_v8 = vld [vmem:[%s1047_s1 + $0x68] sm:$0xff]  }
   0x2   :  { %v716_v1 = vld [vmem:[%s1047_s1 + $0xf8] sm:$0xff]   ;;  %635 = vmatprep.subr.bf16.mxu0 %v715_v0  ;;  %v720_v5 = vld [vmem:[%s1047_s1 + $0xf0] sm:$0xff]   ;;  %v724_v9 = vld [vmem:[%s1047_s1 + $0xe8] sm:$0xff]  }
   0x3   :  { %v717_v2 = vld [vmem:[%s1047_s1 + $0x38] sm:$0xff]   ;;  %675 = vmatprep.subr.bf16.mxu1 %v716_v1  ;;  %v721_v6 = vld [vmem:[%s1047_s1 + $0x30] sm:$0xff]   ;;  %v725_v10 = vld [vmem:[%s1047_s1 + $0x28] sm:$0xff]  }
   0x4   :  { %v718_v3 = vld [vmem:[%s1047_s1 + $0xb8] sm:$0xff]   ;;  %636 = vmatpush3.bf16.msra.mxu0 %v717_v2  ;;  %v722_v7 = vld [vmem:[%s1047_s1 + $0xb0] sm:$0xff]   ;;  %v726_v11 = vld [vmem:[%s1047_s1 + $0xa8] sm:$0xff]  }
   0x5   :  { %676 = vmatpush3.bf16.msra.mxu1 %v718_v3  ;;  %637 = vmatprep.subr.bf16.mxu0 %v719_v4  ;;  %v727_v12 = vld [vmem:[%s1047_s1 + $0x60] sm:$0xff]   ;;  %v731_v16 = vld [vmem:[%s1047_s1 + $0x58] sm:$0xff]   ;;  %v735_v20 = vld [vmem:[%s1047_s1 + $0x50] sm:$0xff]  }
   0x6   :  { %677 = vmatprep.subr.bf16.mxu1 %v720_v5  ;;  %v728_v13 = vld [vmem:[%s1047_s1 + $0xe0] sm:$0xff]   ;;  %v732_v17 = vld [vmem:[%s1047_s1 + $0xd8] sm:$0xff]   ;;  %v736_v21 = vld [vmem:[%s1047_s1 + $0xd0] sm:$0xff]  }
   0x7   :  { %v729_v14 = vld [vmem:[%s1047_s1 + $0x20] sm:$0xff]   ;;  %v733_v18 = vld [vmem:[%s1047_s1 + $0x18] sm:$0xff]   ;;  %v737_v22 = vld [vmem:[%s1047_s1 + $0x10] sm:$0xff]  }
   0x8   :  { %638 = vmatpush3.bf16.msra.mxu0 %v721_v6  ;;  %v730_v15 = vld [vmem:[%s1047_s1 + $0xa0] sm:$0xff]   ;;  %v734_v19 = vld [vmem:[%s1047_s1 + $0x98] sm:$0xff]   ;;  %v738_v23 = vld [vmem:[%s1047_s1 + $0x90] sm:$0xff]  }
   0x9   :  { %678 = vmatpush3.bf16.msra.mxu1 %v722_v7  ;;  %639 = vmatprep.subr.bf16.mxu0 %v723_v8  ;;  %v739_v24 = vld [vmem:[%s1047_s1 + $0x48] sm:$0xff]   ;;  %v743_v28 = vld [vmem:[%s1047_s1 + $0x40] sm:$0xff]  }
   0xa   :  { %679 = vmatprep.subr.bf16.mxu1 %v724_v9  ;;  %v740_v25 = vld [vmem:[%s1047_s1 + $0xc8] sm:$0xff]   ;;  %v744_v29 = vld [vmem:[%s1047_s1 + $0xc0] sm:$0xff]  }
   0xb   :  { %v741_v26 = vld [vmem:[%s1047_s1 + $0x8] sm:$0xff]   ;;  %v745_v30 = vld [vmem:[%s1047_s1] sm:$0xff]  }
   0xc   :  { %640 = vmatpush3.bf16.msra.mxu0 %v725_v10  ;;  %v742_v27 = vld [vmem:[%s1047_s1 + $0x88] sm:$0xff]   ;;  %v746_v31 = vld [vmem:[%s1047_s1 + $0x80] sm:$0xff]  }
   0xd   :  { %680 = vmatpush3.bf16.msra.mxu1 %v726_v11  ;;  %641 = vmatprep.subr.bf16.mxu0 %v727_v12  ;;  %v747_v32 = vld [vmem:[%s1048_s0] ss:$16 sps:$4 sm:$0xff]   ;;  %v749_v33 = vld [vmem:[%s1048_s0 + $0x4] ss:$16 sps:$4 sm:$0xff]   ;;  %v750_v34 = vld [vmem:[%s1048_s0 + $0x8] ss:$16 sps:$4 sm:$0xff]  }
   0xe   :  { %681 = vmatprep.subr.bf16.mxu1 %v728_v13  ;;  %v752_v35 = vld [vmem:[%s1048_s0 + $0xc] ss:$16 sps:$4 sm:$0xff]   ;;  %398 = vmatprep.mubr.bf16.mxu0 %v749_v33  ;;  %v753_v36 = vld [vmem:[%s1048_s0 + $0x24] ss:$16 sps:$4 sm:$0xff]   ;;  %v757_v38 = vld [vmem:[%s1048_s0 + $0x20] ss:$16 sps:$4 sm:$0xff]  }
   0xf   :  { %463 = vmatprep.mubr.bf16.mxu1 %v752_v35  ;;  %v755_v37 = vld [vmem:[%s1048_s0 + $0x2c] ss:$16 sps:$4 sm:$0xff]   ;;  %v758_v39 = vld [vmem:[%s1048_s0 + $0x28] ss:$16 sps:$4 sm:$0xff]   ;;  %v759_v40 = vld [vmem:[%s1048_s0 + $0x44] ss:$16 sps:$4 sm:$0xff]  }
  0x10   :  { %642 = vmatpush3.bf16.msra.mxu0 %v729_v14  ;;  %v761_v41 = vld [vmem:[%s1048_s0 + $0x4c] ss:$16 sps:$4 sm:$0xff]   ;;  %v763_v42 = vld [vmem:[%s1048_s0 + $0x40] ss:$16 sps:$4 sm:$0xff]   ;;  %v764_v43 = vld [vmem:[%s1048_s0 + $0x48] ss:$16 sps:$4 sm:$0xff]  }
  0x11   :  { %682 = vmatpush3.bf16.msra.mxu1 %v730_v15  ;;  %643 = vmatprep.subr.bf16.mxu0 %v731_v16  ;;  %v765_v44 = vld [vmem:[%s1048_s0 + $0x64] ss:$16 sps:$4 sm:$0xff]   ;;  %v767_v45 = vld [vmem:[%s1048_s0 + $0x6c] ss:$16 sps:$4 sm:$0xff]   ;;  %v769_v46 = vld [vmem:[%s1048_s0 + $0x60] ss:$16 sps:$4 sm:$0xff]  }
  0x12   :  { %683 = vmatprep.subr.bf16.mxu1 %v732_v17  ;;  %v770_v47 = vld [vmem:[%s1048_s0 + $0x68] ss:$16 sps:$4 sm:$0xff]  }
  0x14   :  { %644 = vmatpush3.bf16.msra.mxu0 %v733_v18 }
  0x15   :  { %684 = vmatpush3.bf16.msra.mxu1 %v734_v19  ;;  %645 = vmatprep.subr.bf16.mxu0 %v735_v20 }
  0x16   :  { %685 = vmatprep.subr.bf16.mxu1 %v736_v21 }
  0x18   :  { %646 = vmatpush3.bf16.msra.mxu0 %v737_v22 }
  0x19   :  { %686 = vmatpush3.bf16.msra.mxu1 %v738_v23  ;;  %647 = vmatprep.subr.bf16.mxu0 %v739_v24 }
  0x1a   :  { %687 = vmatprep.subr.bf16.mxu1 %v740_v25 }
  0x1c   :  { %648 = vmatpush3.bf16.msra.mxu0 %v741_v26 }
  0x1d   :  { %688 = vmatpush3.bf16.msra.mxu1 %v742_v27  ;;  %649 = vmatprep.subr.bf16.mxu0 %v743_v28 }
  0x1e   :  { %689 = vmatprep.subr.bf16.mxu1 %v744_v29 }
  0x20   :  { %650 = vmatpush3.bf16.msra.mxu0 %v745_v30 }
  0x21   :  { %690 = vmatpush3.bf16.msra.mxu1 %v746_v31 }
  0x23   :  { %399 = vmatmul.mubr.bf16.vlgmr.msra.gmra.mxu0 %v747_v32 }
  0x24   :  { %464 = vmatmul.mubr.bf16.vlgmr.msra.gmra.mxu1 %v750_v34  ;;  %406 = vmatprep.mubr.bf16.mxu0 %v753_v36 }
  0x25   :  { %471 = vmatprep.mubr.bf16.mxu1 %v755_v37 }
  0x2b   :  { %407 = vmatmul.mubr.bf16.gmra.mxu0 %v757_v38 }
  0x2c   :  { %472 = vmatmul.mubr.bf16.gmra.mxu1 %v758_v39  ;;  %414 = vmatprep.mubr.bf16.mxu0 %v759_v40 }
  0x2d   :  { %479 = vmatprep.mubr.bf16.mxu1 %v761_v41 }
  0x33   :  { %415 = vmatmul.mubr.bf16.gmra.mxu0 %v763_v42 }
  0x34   :  { %480 = vmatmul.mubr.bf16.gmra.mxu1 %v764_v43  ;;  %422 = vmatprep.mubr.bf16.mxu0 %v765_v44 }
  0x35   :  { %487 = vmatprep.mubr.bf16.mxu1 %v767_v45 }
  0x3b   :  { %423 = vmatmul.mubr.bf16.gmra.mxu0 %v769_v46 }
  0x3c   :  { %488 = vmatmul.mubr.bf16.gmra.mxu1 %v770_v47 }
  0xe3   :  { %v651_v48 = vpop.f32.mrf.mxu0 }
  0xe4   :  { %v691_v49 = vpop.f32.mrf.mxu1 }
  0xe5   :  { %v652_v50 = vpop.f32.mrf.mxu0 }
  0xe6   :  { %v653_v51 = vadd.f32 %v652_v50, %v651_v48  ;;  %v692_v52 = vpop.f32.mrf.mxu1 }
  0xe7   :  { %v693_v53 = vadd.f32 %v692_v52, %v691_v49  ;;  %v654_v54 = vpop.f32.mrf.mxu0 }
  0xe8   :  { %v694_v55 = vpop.f32.mrf.mxu1 }
  0xe9   :  { %v466_v56 = vadd.f32 %v693_v53, %v653_v51  ;;  %v655_v57 = vpop.f32.mrf.mxu0 }
  0xea   :  { %v656_v58 = vadd.f32 %v655_v57, %v654_v54  ;;  %v695_v59 = vpop.f32.mrf.mxu1 }
  0xeb   :  { %497 = vst.msk [vmem:[%s1049_s2] sm:$0xff] %vm496_vm0, %v466_v56  ;;  %v696_v60 = vadd.f32 %v695_v59, %v694_v55  ;;  %v657_v61 = vpop.f32.mrf.mxu0  ;;  %v505_v62 = vsel %vm496_vm0, %v466_v56, 0.0  ;;  %v529_v63 = vmul.f32 %v466_v56, %v466_v56 }
  0xec   :  { %v697_v0 = vpop.f32.mrf.mxu1  ;;  %506 = vadd.xlane.f32.xlu0 %v505_v62 }
  0xed   :  { %v469_v1 = vadd.f32 %v696_v60, %v656_v58  ;;  %v658_v2 = vpop.f32.mrf.mxu0  ;;  %v537_v7 = vsel %vm496_vm0, %v529_v63, 0.0 }
  0xee   :  { %v659_v3 = vadd.f32 %v658_v2, %v657_v61  ;;  %v698_v4 = vpop.f32.mrf.mxu1 }
  0xef   :  { %498 = vst.msk [vmem:[%s1049_s2 + $0x8] sm:$0xff] %vm496_vm0, %v469_v1  ;;  %v699_v5 = vadd.f32 %v698_v4, %v697_v0  ;;  %v660_v6 = vpop.f32.mrf.mxu0  ;;  %v530_v8 = vmul.f32 %v469_v1, %v469_v1  ;;  %v508_v17 = vsel %vm496_vm0, %v469_v1, 0.0 }
  0xf0   :  { %v700_v9 = vpop.f32.mrf.mxu1  ;;  %538 = vadd.xlane.f32.xlu0 %v537_v7 }
  0xf1   :  { %v474_v10 = vadd.f32 %v699_v5, %v659_v3  ;;  %v661_v11 = vpop.f32.mrf.mxu0  ;;  %v540_v12 = vsel %vm496_vm0, %v530_v8, 0.0 }
  0xf2   :  { %v662_v13 = vadd.f32 %v661_v11, %v660_v6  ;;  %v701_v14 = vpop.f32.mrf.mxu1  ;;  %541 = vadd.xlane.f32.xlu1 %v540_v12 }
  0xf3   :  { %499 = vst.msk [vmem:[%s1049_s2 + $0x10] sm:$0xff] %vm496_vm0, %v474_v10  ;;  %v702_v15 = vadd.f32 %v701_v14, %v700_v9  ;;  %v663_v16 = vpop.f32.mrf.mxu0  ;;  %v531_v18 = vmul.f32 %v474_v10, %v474_v10  ;;  %v511_v22 = vsel %vm496_vm0, %v474_v10, 0.0 }
  0xf4   :  { %v703_v19 = vpop.f32.mrf.mxu1  ;;  %509 = vadd.xlane.f32.xlu0 %v508_v17 }
  0xf5   :  { %v477_v20 = vadd.f32 %v702_v15, %v662_v13  ;;  %v664_v21 = vpop.f32.mrf.mxu0  ;;  %v543_v27 = vsel %vm496_vm0, %v531_v18, 0.0 }
  0xf6   :  { %v665_v23 = vadd.f32 %v664_v21, %v663_v16  ;;  %v704_v24 = vpop.f32.mrf.mxu1  ;;  %512 = vadd.xlane.f32.xlu1 %v511_v22 }
  0xf7   :  { %500 = vst.msk [vmem:[%s1049_s2 + $0x18] sm:$0xff] %vm496_vm0, %v477_v20  ;;  %v705_v25 = vadd.f32 %v704_v24, %v703_v19  ;;  %v666_v26 = vpop.f32.mrf.mxu0  ;;  %v514_v31 = vsel %vm496_vm0, %v477_v20, 0.0  ;;  %v532_v32 = vmul.f32 %v477_v20, %v477_v20 }
  0xf8   :  { %v706_v28 = vpop.f32.mrf.mxu1  ;;  %544 = vadd.xlane.f32.xlu0 %v543_v27 }
  0xf9   :  { %v482_v29 = vadd.f32 %v705_v25, %v665_v23  ;;  %v667_v30 = vpop.f32.mrf.mxu0  ;;  %v546_v42 = vsel %vm496_vm0, %v532_v32, 0.0 }
  0xfa   :  { %v668_v33 = vadd.f32 %v667_v30, %v666_v26  ;;  %v707_v34 = vpop.f32.mrf.mxu1  ;;  %515 = vadd.xlane.f32.xlu1 %v514_v31 }
  0xfb   :  { %501 = vst.msk [vmem:[%s1049_s2 + $0x20] sm:$0xff] %vm496_vm0, %v482_v29  ;;  %v708_v35 = vadd.f32 %v707_v34, %v706_v28  ;;  %v669_v36 = vpop.f32.mrf.mxu0  ;;  %v517_v37 = vsel %vm496_vm0, %v482_v29, 0.0  ;;  %v533_v38 = vmul.f32 %v482_v29, %v482_v29 }
  0xfc   :  { %v709_v39 = vpop.f32.mrf.mxu1  ;;  %518 = vadd.xlane.f32.xlu0 %v517_v37 }
  0xfd   :  { %v485_v40 = vadd.f32 %v708_v35, %v668_v33  ;;  %v670_v41 = vpop.f32.mrf.mxu0  ;;  %v549_v47 = vsel %vm496_vm0, %v533_v38, 0.0 }
  0xfe   :  { %v671_v43 = vadd.f32 %v670_v41, %v669_v36  ;;  %v710_v44 = vpop.f32.mrf.mxu1  ;;  %547 = vadd.xlane.f32.xlu1 %v546_v42 }
  0xff   :  { %502 = vst.msk [vmem:[%s1049_s2 + $0x28] sm:$0xff] %vm496_vm0, %v485_v40  ;;  %v711_v45 = vadd.f32 %v710_v44, %v709_v39  ;;  %v672_v46 = vpop.f32.mrf.mxu0  ;;  %v520_v51 = vsel %vm496_vm0, %v485_v40, 0.0  ;;  %v534_v52 = vmul.f32 %v485_v40, %v485_v40 }
 0x100   :  { %v712_v48 = vpop.f32.mrf.mxu1  ;;  %550 = vadd.xlane.f32.xlu0 %v549_v47 }
 0x101   :  { %v490_v49 = vadd.f32 %v711_v45, %v671_v43  ;;  %v673_v50 = vpop.f32.mrf.mxu0  ;;  %v552_v59 = vsel %vm496_vm0, %v534_v52, 0.0 }
 0x102   :  { %v674_v53 = vadd.f32 %v673_v50, %v672_v46  ;;  %v713_v54 = vpop.f32.mrf.mxu1  ;;  %521 = vadd.xlane.f32.xlu1 %v520_v51 }
 0x103   :  { %503 = vst.msk [vmem:[%s1049_s2 + $0x30] sm:$0xff] %vm496_vm0, %v490_v49  ;;  %v714_v55 = vadd.f32 %v713_v54, %v712_v48  ;;  %v523_v56 = vsel %vm496_vm0, %v490_v49, 0.0  ;;  %v535_v57 = vmul.f32 %v490_v49, %v490_v49 }
 0x104   :  { %524 = vadd.xlane.f32.xlu0 %v523_v56 }
 0x105   :  { %v493_v58 = vadd.f32 %v714_v55, %v674_v53  ;;  %v555_v60 = vsel %vm496_vm0, %v535_v57, 0.0 }
 0x106   :  { %553 = vadd.xlane.f32.xlu1 %v552_v59 }
 0x107   :  { %504 = vst.msk [vmem:[%s1049_s2 + $0x38] sm:$0xff] %vm496_vm0, %v493_v58  ;;  %v526_v61 = vsel %vm496_vm0, %v493_v58, 0.0  ;;  %v536_v62 = vmul.f32 %v493_v58, %v493_v58 }
 0x108   :  { %556 = vadd.xlane.f32.xlu0 %v555_v60 }
 0x109   :  { %v558_v63 = vsel %vm496_vm0, %v536_v62, 0.0 }
 0x10a   :  { %527 = vadd.xlane.f32.xlu1 %v526_v61 }
 0x10e   :  { %559 = vadd.xlane.f32.xlu1 %v558_v63 }
 0x175   :  { %v507_v0 = vpop.xlane.xlu0 %506 }
 0x176   :  { %562 = vst.msk [vmem:[%s1050_s3] sm:$0xff] %vm561_vm1, %v507_v0 }
 0x179   :  { %v539_v1 = vpop.xlane.xlu0 %538 }
 0x17a   :  { %571 = vst.msk [vmem:[%s1050_s3] sm:$0xff] %vm570_vm2, %v539_v1 }
 0x17b   :  { %v542_v2 = vpop.xlane.xlu1 %541 }
 0x17d   :  { %v510_v3 = vpop.xlane.xlu0 %509 }
 0x17e   :  { %563 = vst.msk [vmem:[%s1050_s3 + $0x8] sm:$0xff] %vm561_vm1, %v510_v3 }
 0x17f   :  { %572 = vst.msk [vmem:[%s1050_s3 + $0x8] sm:$0xff] %vm570_vm2, %v542_v2  ;;  %v513_v4 = vpop.xlane.xlu1 %512 }
 0x180   :  { %564 = vst.msk [vmem:[%s1050_s3 + $0x10] sm:$0xff] %vm561_vm1, %v513_v4 }
 0x181   :  { %v545_v5 = vpop.xlane.xlu0 %544 }
 0x182   :  { %573 = vst.msk [vmem:[%s1050_s3 + $0x10] sm:$0xff] %vm570_vm2, %v545_v5 }
 0x183   :  { %v516_v6 = vpop.xlane.xlu1 %515 }
 0x184   :  { %565 = vst.msk [vmem:[%s1050_s3 + $0x18] sm:$0xff] %vm561_vm1, %v516_v6 }
 0x185   :  { %v519_v7 = vpop.xlane.xlu0 %518 }
 0x186   :  { %566 = vst.msk [vmem:[%s1050_s3 + $0x20] sm:$0xff] %vm561_vm1, %v519_v7 }
 0x187   :  { %v548_v8 = vpop.xlane.xlu1 %547 }
 0x188   :  { %574 = vst.msk [vmem:[%s1050_s3 + $0x18] sm:$0xff] %vm570_vm2, %v548_v8 }
 0x189   :  { %v551_v9 = vpop.xlane.xlu0 %550 }
 0x18a   :  { %575 = vst.msk [vmem:[%s1050_s3 + $0x20] sm:$0xff] %vm570_vm2, %v551_v9 }
 0x18b   :  { %v522_v10 = vpop.xlane.xlu1 %521 }
 0x18c   :  { %567 = vst.msk [vmem:[%s1050_s3 + $0x28] sm:$0xff] %vm561_vm1, %v522_v10 }
 0x18d   :  { %v525_v11 = vpop.xlane.xlu0 %524 }
 0x18e   :  { %568 = vst.msk [vmem:[%s1050_s3 + $0x30] sm:$0xff] %vm561_vm1, %v525_v11 }
 0x18f   :  { %v554_v12 = vpop.xlane.xlu1 %553 }
 0x190   :  { %576 = vst.msk [vmem:[%s1050_s3 + $0x28] sm:$0xff] %vm570_vm2, %v554_v12 }
 0x191   :  { %v557_v13 = vpop.xlane.xlu0 %556 }
 0x192   :  { %577 = vst.msk [vmem:[%s1050_s3 + $0x30] sm:$0xff] %vm570_vm2, %v557_v13 }
 0x193   :  { %v528_v14 = vpop.xlane.xlu1 %527 }
 0x194   :  { %569 = vst.msk [vmem:[%s1050_s3 + $0x38] sm:$0xff] %vm561_vm1, %v528_v14 }
 0x197   :  { %v560_v15 = vpop.xlane.xlu1 %559 }
 0x198   :  { %578 = vst.msk [vmem:[%s1050_s3 + $0x38] sm:$0xff] %vm570_vm2, %v560_v15 }

// kernel: discriminator_forward.14
= control target key start
LH: loop header
LB: loop body
LE: loop exit
PB: predicated region body
PF: predicated region fallthrough
CT: control target
= control target key end

     0   :  { %v206_v0 = vmov 0   ;;  %v207_v9 = vmov 1   ;;  %vm171_vm2 = vcmask 257024   ;;  %s303_s0 = inlined_call_operand.vmem [shape: f32[64,2], index: 0, kind: input, shape index: {}]   ;;  %s304_s1 = inlined_call_operand.vmem [shape: f32[64,32], index: 1, kind: input, shape index: {}]   ;;  %s305_s2 = inlined_call_operand.vmem [shape: bf16[64,32], index: 2, kind: output, shape index: {}]  }
   0x1   :  { %203 = vset.pattern.permute.xlu1 %v206_v0  ;;  %202 = vset.pattern.permute.xlu0 %v206_v0  ;;  %v21_v1 = vld [vmem:[%s303_s0 + $0x10] sm:$0xff]  ;;  %v19_v2 = vld [vmem:[%s303_s0] sm:$0xff]  ;;  %v22_v3 = vld [vmem:[%s303_s0 + $0x18] sm:$0xff] }
   0x2   :  { %39 = vperm.xlu1 %203, %v21_v1   ;;  %29 = vperm.xlu0 %202, %v19_v2   ;;  %v20_v4 = vld [vmem:[%s303_s0 + $0x8] sm:$0xff]  ;;  %v23_v6 = vld [vmem:[%s303_s0 + $0x20] sm:$0xff]  ;;  %v26_v7 = vld [vmem:[%s303_s0 + $0x38] sm:$0xff] }
   0x3   :  { %v24_v5 = vld [vmem:[%s303_s0 + $0x28] sm:$0xff]  ;;  %v25_v8 = vld [vmem:[%s303_s0 + $0x30] sm:$0xff]  ;;  %v11_v18 = vld [vmem:[%s304_s1] sm:$0xff] }
   0x4   :  { %v12_v19 = vld [vmem:[%s304_s1 + $0x8] sm:$0xff]  ;;  %v13_v20 = vld [vmem:[%s304_s1 + $0x10] sm:$0xff]  ;;  %v14_v22 = vld [vmem:[%s304_s1 + $0x18] sm:$0xff] }
   0x5   :  { %v16_v30 = vld [vmem:[%s304_s1 + $0x28] sm:$0xff]  ;;  %v15_v31 = vld [vmem:[%s304_s1 + $0x20] sm:$0xff]  ;;  %v18_v42 = vld [vmem:[%s304_s1 + $0x38] sm:$0xff] }
   0x6   :  { %44 = vperm.xlu1 %203, %v22_v3   ;;  %34 = vperm.xlu0 %202, %v20_v4   ;;  %v17_v43 = vld [vmem:[%s304_s1 + $0x30] sm:$0xff] }
   0xa   :  { %54 = vperm.xlu1 %203, %v24_v5   ;;  %49 = vperm.xlu0 %202, %v23_v6  }
   0xe   :  { %64 = vperm.xlu1 %203, %v26_v7   ;;  %59 = vperm.xlu0 %202, %v25_v8  }
  0x12   :  { %205 = vset.pattern.permute.xlu1 %v207_v9  ;;  %204 = vset.pattern.permute.xlu0 %v207_v9 }
  0x13   :  { %80 = vperm.xlu1 %205, %v20_v4   ;;  %76 = vperm.xlu0 %204, %v19_v2  }
  0x17   :  { %84 = vperm.xlu1 %205, %v21_v1   ;;  %88 = vperm.xlu0 %204, %v22_v3  }
  0x1b   :  { %92 = vperm.xlu1 %205, %v23_v6   ;;  %96 = vperm.xlu0 %204, %v24_v5  }
  0x1f   :  { %100 = vperm.xlu1 %205, %v25_v8   ;;  %104 = vperm.xlu0 %204, %v26_v7  }
  0x7d   :  { %v40_v10 = vpop.permute.xlu1 %39  ;;  %v30_v11 = vpop.permute.xlu0 %29 }
  0x7e   :  { %v67_v21 = vsub.f32 %v11_v18, %v30_v11  ;;  %v69_v28 = vsub.f32 %v13_v20, %v40_v10 }
  0x81   :  { %v45_v12 = vpop.permute.xlu1 %44  ;;  %v35_v13 = vpop.permute.xlu0 %34 }
  0x82   :  { %v68_v23 = vsub.f32 %v12_v19, %v35_v13  ;;  %v70_v29 = vsub.f32 %v14_v22, %v45_v12 }
  0x85   :  { %v55_v14 = vpop.permute.xlu1 %54  ;;  %v50_v15 = vpop.permute.xlu0 %49 }
  0x86   :  { %v72_v40 = vsub.f32 %v16_v30, %v55_v14  ;;  %v71_v41 = vsub.f32 %v15_v31, %v50_v15 }
  0x89   :  { %v65_v16 = vpop.permute.xlu1 %64  ;;  %v60_v17 = vpop.permute.xlu0 %59 }
  0x8a   :  { %v74_v54 = vsub.f32 %v18_v42, %v65_v16  ;;  %v73_v55 = vsub.f32 %v17_v43, %v60_v17 }
  0x8e   :  { %v81_v24 = vpop.permute.xlu1 %80  ;;  %v77_v25 = vpop.permute.xlu0 %76 }
  0x8f   :  { %v108_v26 = vmul.f32 %v81_v24, %v68_v23  ;;  %v107_v27 = vmul.f32 %v77_v25, %v67_v21 }
  0x91   :  { %vm116_vm0 = vcmp.gt.f32.partialorder %v108_v26, 0.0  ;;  %v124_v32 = vmul.f32 0.2, %v108_v26  ;;  %vm115_vm1 = vcmp.gt.f32.partialorder %v107_v27, 0.0  ;;  %v123_v33 = vmul.f32 0.2, %v107_v27 }
  0x92   :  { %v85_v34 = vpop.permute.xlu1 %84  ;;  %v89_v35 = vpop.permute.xlu0 %88 }
  0x93   :  { %v132_v36 = vsel %vm116_vm0, %v108_v26, %v124_v32  ;;  %v131_v37 = vsel %vm115_vm1, %v107_v27, %v123_v33  ;;  %v109_v38 = vmul.f32 %v85_v34, %v69_v28  ;;  %v110_v39 = vmul.f32 %v89_v35, %v70_v29 }
  0x94   :  { %v193_v44 = vpack.c.bf16 %v132_v36, %v132_v36  ;;  %v192_v45 = vpack.c.bf16 %v131_v37, %v131_v37 }
  0x95   :  { %vm117_vm3 = vcmp.gt.f32.partialorder %v109_v38, 0.0  ;;  %v125_v46 = vmul.f32 0.2, %v109_v38  ;;  %vm118_vm4 = vcmp.gt.f32.partialorder %v110_v39, 0.0  ;;  %v126_v47 = vmul.f32 0.2, %v110_v39 }
  0x96   :  { %173 = vst.msk [vmem:[%s305_s2 + $0x4] sm:$0xf] %vm171_vm2, %v193_v44  ;;  %172 = vst.msk [vmem:[%s305_s2] sm:$0xf] %vm171_vm2, %v192_v45  ;;  %v93_v48 = vpop.permute.xlu1 %92  ;;  %v97_v49 = vpop.permute.xlu0 %96 }
  0x97   :  { %v133_v50 = vsel %vm117_vm3, %v109_v38, %v125_v46  ;;  %v134_v51 = vsel %vm118_vm4, %v110_v39, %v126_v47  ;;  %v111_v52 = vmul.f32 %v93_v48, %v71_v41  ;;  %v112_v53 = vmul.f32 %v97_v49, %v72_v40 }
  0x98   :  { %v194_v56 = vpack.c.bf16 %v133_v50, %v133_v50  ;;  %v195_v57 = vpack.c.bf16 %v134_v51, %v134_v51 }
  0x99   :  { %vm119_vm5 = vcmp.gt.f32.partialorder %v111_v52, 0.0  ;;  %v127_v58 = vmul.f32 0.2, %v111_v52  ;;  %vm120_vm6 = vcmp.gt.f32.partialorder %v112_v53, 0.0  ;;  %v128_v59 = vmul.f32 0.2, %v112_v53 }
  0x9a   :  { %174 = vst.msk [vmem:[%s305_s2 + $0x8] sm:$0xf] %vm171_vm2, %v194_v56  ;;  %175 = vst.msk [vmem:[%s305_s2 + $0xc] sm:$0xf] %vm171_vm2, %v195_v57  ;;  %v101_v60 = vpop.permute.xlu1 %100  ;;  %v105_v61 = vpop.permute.xlu0 %104 }
  0x9b   :  { %v135_v62 = vsel %vm119_vm5, %v111_v52, %v127_v58  ;;  %v136_v63 = vsel %vm120_vm6, %v112_v53, %v128_v59  ;;  %v113_v0 = vmul.f32 %v101_v60, %v73_v55  ;;  %v114_v1 = vmul.f32 %v105_v61, %v74_v54 }
  0x9c   :  { %v196_v2 = vpack.c.bf16 %v135_v62, %v135_v62  ;;  %v197_v3 = vpack.c.bf16 %v136_v63, %v136_v63 }
  0x9d   :  { %vm121_vm7 = vcmp.gt.f32.partialorder %v113_v0, 0.0  ;;  %v129_v4 = vmul.f32 0.2, %v113_v0  ;;  %vm122_vm8 = vcmp.gt.f32.partialorder %v114_v1, 0.0  ;;  %v130_v5 = vmul.f32 0.2, %v114_v1 }
  0x9e   :  { %176 = vst.msk [vmem:[%s305_s2 + $0x10] sm:$0xf] %vm171_vm2, %v196_v2  ;;  %177 = vst.msk [vmem:[%s305_s2 + $0x14] sm:$0xf] %vm171_vm2, %v197_v3 }
  0x9f   :  { %v137_v6 = vsel %vm121_vm7, %v113_v0, %v129_v4  ;;  %v138_v7 = vsel %vm122_vm8, %v114_v1, %v130_v5 }
  0xa0   :  { %v198_v8 = vpack.c.bf16 %v137_v6, %v137_v6  ;;  %v199_v9 = vpack.c.bf16 %v138_v7, %v138_v7 }
  0xa2   :  { %178 = vst.msk [vmem:[%s305_s2 + $0x18] sm:$0xf] %vm171_vm2, %v198_v8  ;;  %179 = vst.msk [vmem:[%s305_s2 + $0x1c] sm:$0xf] %vm171_vm2, %v199_v9 }

// kernel: discriminator_forward.15
= control target key start
LH: loop header
LB: loop body
LE: loop exit
PB: predicated region body
PF: predicated region fallthrough
CT: control target
= control target key end

     0   :  { %v147_v28 = vlaneseq  ;;  %v1012_v36 = vmov 1966171168   ;;  %s1240_s0 = inlined_call_operand.vmem [shape: bf16[1,1024], index: 0, kind: input, shape index: {}]   ;;  %s1241_s1 = inlined_call_operand.vmem [shape: bf16[1024,2], index: 1, kind: input, shape index: {}]   ;;  %s1242_s2 = inlined_call_operand.hbm [shape: f32[1,2], index: 2, kind: output, shape index: {}]  }
   0x1   :  { %v921_v0 = vld [vmem:[%s1241_s1 + $0x78] sm:$0xff]   ;;  %v925_v4 = vld [vmem:[%s1241_s1 + $0x70] sm:$0xff]   ;;  %v929_v8 = vld [vmem:[%s1241_s1 + $0x68] sm:$0xff]   ;;  %v145_v37 = vunpack.c.l.s4 %v1012_v36 }
   0x2   :  { %v922_v1 = vld [vmem:[%s1241_s1 + $0xf8] sm:$0xff]   ;;  %831 = vmatprep.subr.bf16.mxu0 %v921_v0  ;;  %v926_v5 = vld [vmem:[%s1241_s1 + $0xf0] sm:$0xff]   ;;  %v930_v9 = vld [vmem:[%s1241_s1 + $0xe8] sm:$0xff]   ;;  %v148_v33 = vshrl.u32 %v147_v28, 7 }
   0x3   :  { %v923_v2 = vld [vmem:[%s1241_s1 + $0x38] sm:$0xff]   ;;  %853 = vmatprep.subr.bf16.mxu1 %v922_v1  ;;  %v927_v6 = vld [vmem:[%s1241_s1 + $0x30] sm:$0xff]   ;;  %v931_v10 = vld [vmem:[%s1241_s1 + $0x28] sm:$0xff]   ;;  %v146_v40 = vunpack.c.0.s8 %v145_v37 }
   0x4   :  { %v924_v3 = vld [vmem:[%s1241_s1 + $0xb8] sm:$0xff]   ;;  %832 = vmatpush3.bf16.msra.mxu0 %v923_v2  ;;  %v928_v7 = vld [vmem:[%s1241_s1 + $0xb0] sm:$0xff]   ;;  %v932_v11 = vld [vmem:[%s1241_s1 + $0xa8] sm:$0xff]  }
   0x5   :  { %854 = vmatpush3.bf16.msra.mxu1 %v924_v3  ;;  %833 = vmatprep.subr.bf16.mxu0 %v925_v4  ;;  %v933_v12 = vld [vmem:[%s1241_s1 + $0x60] sm:$0xff]   ;;  %v937_v16 = vld [vmem:[%s1241_s1 + $0x58] sm:$0xff]   ;;  %v941_v20 = vld [vmem:[%s1241_s1 + $0x50] sm:$0xff]   ;;  %v1134_v41 = vsub.s32 %v146_v40, %v148_v33 }
   0x6   :  { %855 = vmatprep.subr.bf16.mxu1 %v926_v5  ;;  %v934_v13 = vld [vmem:[%s1241_s1 + $0xe0] sm:$0xff]   ;;  %v938_v17 = vld [vmem:[%s1241_s1 + $0xd8] sm:$0xff]   ;;  %v942_v21 = vld [vmem:[%s1241_s1 + $0xd0] sm:$0xff]  }
   0x7   :  { %v935_v14 = vld [vmem:[%s1241_s1 + $0x20] sm:$0xff]   ;;  %v939_v18 = vld [vmem:[%s1241_s1 + $0x18] sm:$0xff]   ;;  %v943_v22 = vld [vmem:[%s1241_s1 + $0x10] sm:$0xff]  }
   0x8   :  { %834 = vmatpush3.bf16.msra.mxu0 %v927_v6  ;;  %v936_v15 = vld [vmem:[%s1241_s1 + $0xa0] sm:$0xff]   ;;  %v940_v19 = vld [vmem:[%s1241_s1 + $0x98] sm:$0xff]   ;;  %v944_v23 = vld [vmem:[%s1241_s1 + $0x90] sm:$0xff]  }
   0x9   :  { %856 = vmatpush3.bf16.msra.mxu1 %v928_v7  ;;  %835 = vmatprep.subr.bf16.mxu0 %v929_v8  ;;  %v945_v24 = vld [vmem:[%s1241_s1 + $0x48] sm:$0xff]   ;;  %v949_v29 = vld [vmem:[%s1241_s1 + $0x40] sm:$0xff]   ;;  %v954_v35 = vld [vmem:[%s1241_s1 + $0x178] sm:$0xff]  }
   0xa   :  { %857 = vmatprep.subr.bf16.mxu1 %v930_v9  ;;  %v946_v25 = vld [vmem:[%s1241_s1 + $0xc8] sm:$0xff]   ;;  %v950_v30 = vld [vmem:[%s1241_s1 + $0xc0] sm:$0xff]   ;;  %v955_v38 = vld [vmem:[%s1241_s1 + $0x1f8] sm:$0xff]  }
   0xb   :  { %v947_v26 = vld [vmem:[%s1241_s1 + $0x8] sm:$0xff]   ;;  %v951_v31 = vld [vmem:[%s1241_s1] sm:$0xff]   ;;  %v956_v48 = vld [vmem:[%s1241_s1 + $0x138] sm:$0xff]  }
   0xc   :  { %836 = vmatpush3.bf16.msra.mxu0 %v931_v10  ;;  %v948_v27 = vld [vmem:[%s1241_s1 + $0x88] sm:$0xff]   ;;  %v952_v32 = vld [vmem:[%s1241_s1 + $0x80] sm:$0xff]   ;;  %v958_v51 = vld [vmem:[%s1241_s1 + $0x170] sm:$0xff]  }
   0xd   :  { %858 = vmatpush3.bf16.msra.mxu1 %v932_v11  ;;  %837 = vmatprep.subr.bf16.mxu0 %v933_v12  ;;  %v13_v34 = vld [vmem:[%s1240_s0] sm:$0xff]  ;;  %v957_v53 = vld [vmem:[%s1241_s1 + $0x1b8] sm:$0xff]   ;;  %v959_v54 = vld [vmem:[%s1241_s1 + $0x1f0] sm:$0xff]  }
   0xe   :  { %859 = vmatprep.subr.bf16.mxu1 %v934_v13  ;;  %v143_v39 = vcombine.high %v13_v34, %v13_v34  ;;  %v150_v42 = vrot.slane %v13_v34, %v1134_v41  ;;  %v960_v56 = vld [vmem:[%s1241_s1 + $0x130] sm:$0xff]   ;;  %v962_v57 = vld [vmem:[%s1241_s1 + $0x168] sm:$0xff]   ;;  %v966_v61 = vld [vmem:[%s1241_s1 + $0x160] sm:$0xff]  }
   0xf   :  { %v961_v58 = vld [vmem:[%s1241_s1 + $0x1b0] sm:$0xff]   ;;  %v963_v59 = vld [vmem:[%s1241_s1 + $0x1e8] sm:$0xff]   ;;  %v967_v63 = vld [vmem:[%s1241_s1 + $0x1e0] sm:$0xff]  }
  0x10   :  { %838 = vmatpush3.bf16.msra.mxu0 %v935_v14  ;;  %v1138_v43 = vrot.slane %v143_v39, %v1134_v41  ;;  %v158_v44 = vcombine.high %v150_v42, %v150_v42  ;;  %v166_v45 = vrot.slane %v150_v42, %v1134_v41  ;;  %v964_v60 = vld [vmem:[%s1241_s1 + $0x128] sm:$0xff]   ;;  %v968_v0 = vld [vmem:[%s1241_s1 + $0x120] sm:$0xff]   ;;  %v970_v1 = vld [vmem:[%s1241_s1 + $0x158] sm:$0xff]  }
  0x11   :  { %860 = vmatpush3.bf16.msra.mxu1 %v936_v15  ;;  %839 = vmatprep.subr.bf16.mxu0 %v937_v16  ;;  %v965_v62 = vld [vmem:[%s1241_s1 + $0x1a8] sm:$0xff]   ;;  %v969_v2 = vld [vmem:[%s1241_s1 + $0x1a0] sm:$0xff]   ;;  %v971_v3 = vld [vmem:[%s1241_s1 + $0x1d8] sm:$0xff]  }
  0x12   :  { %861 = vmatprep.subr.bf16.mxu1 %v938_v17  ;;  %v159_v46 = vcombine.high %v1138_v43, %v1138_v43  ;;  %v180_v47 = vrot.slane %v158_v44, %v1134_v41  ;;  %v188_v50 = vcombine.high %v166_v45, %v166_v45  ;;  %v972_v4 = vld [vmem:[%s1241_s1 + $0x118] sm:$0xff]   ;;  %v974_v5 = vld [vmem:[%s1241_s1 + $0x150] sm:$0xff]   ;;  %v978_v9 = vld [vmem:[%s1241_s1 + $0x148] sm:$0xff]  }
  0x13   :  { %v973_v6 = vld [vmem:[%s1241_s1 + $0x198] sm:$0xff]   ;;  %v975_v7 = vld [vmem:[%s1241_s1 + $0x1d0] sm:$0xff]  }
  0x14   :  { %840 = vmatpush3.bf16.msra.mxu0 %v939_v18  ;;  %v187_v49 = vrot.slane %v159_v46, %v1134_v41  ;;  %616 = vmatprep.mubr.bf16.mxu0 %v180_v47  ;;  %v190_v52 = vcombine.high %v180_v47, %v180_v47  ;;  %v976_v8 = vld [vmem:[%s1241_s1 + $0x110] sm:$0xff]  }
  0x15   :  { %862 = vmatpush3.bf16.msra.mxu1 %v940_v19  ;;  %841 = vmatprep.subr.bf16.mxu0 %v941_v20 }
  0x16   :  { %863 = vmatprep.subr.bf16.mxu1 %v942_v21  ;;  %v191_v55 = vcombine.high %v187_v49, %v187_v49  ;;  %656 = vmatprep.mubr.bf16.mxu1 %v190_v52 }
  0x18   :  { %842 = vmatpush3.bf16.msra.mxu0 %v943_v22 }
  0x19   :  { %864 = vmatpush3.bf16.msra.mxu1 %v944_v23  ;;  %843 = vmatprep.subr.bf16.mxu0 %v945_v24 }
  0x1a   :  { %865 = vmatprep.subr.bf16.mxu1 %v946_v25 }
  0x1c   :  { %844 = vmatpush3.bf16.msra.mxu0 %v947_v26 }
  0x1d   :  { %866 = vmatpush3.bf16.msra.mxu1 %v948_v27  ;;  %845 = vmatprep.subr.bf16.mxu0 %v949_v29 }
  0x1e   :  { %867 = vmatprep.subr.bf16.mxu1 %v950_v30 }
  0x20   :  { %846 = vmatpush3.bf16.msra.mxu0 %v951_v31 }
  0x21   :  { %868 = vmatpush3.bf16.msra.mxu1 %v952_v32  ;;  %875 = vmatprep.subr.bf16.mxu0 %v954_v35 }
  0x22   :  { %897 = vmatprep.subr.bf16.mxu1 %v955_v38 }
  0x23   :  { %617 = vmatmul.mubr.bf16.vlgmr.msra.gmra.mxu0 %v166_v45 }
  0x24   :  { %876 = vmatpush3.bf16.msra.mxu0 %v956_v48  ;;  %657 = vmatmul.mubr.bf16.vlgmr.msra.gmra.mxu1 %v188_v50 }
  0x25   :  { %877 = vmatprep.subr.bf16.mxu0 %v958_v51  ;;  %898 = vmatpush3.bf16.msra.mxu1 %v957_v53 }
  0x26   :  { %696 = vmatprep.mubr.bf16.mxu0 %v187_v49  ;;  %899 = vmatprep.subr.bf16.mxu1 %v959_v54 }
  0x27   :  { %736 = vmatprep.mubr.bf16.mxu1 %v191_v55 }
  0x28   :  { %878 = vmatpush3.bf16.msra.mxu0 %v960_v56 }
  0x29   :  { %879 = vmatprep.subr.bf16.mxu0 %v962_v57  ;;  %900 = vmatpush3.bf16.msra.mxu1 %v961_v58 }
  0x2a   :  { %901 = vmatprep.subr.bf16.mxu1 %v963_v59 }
  0x2c   :  { %880 = vmatpush3.bf16.msra.mxu0 %v964_v60 }
  0x2d   :  { %881 = vmatprep.subr.bf16.mxu0 %v966_v61  ;;  %902 = vmatpush3.bf16.msra.mxu1 %v965_v62 }
  0x2e   :  { %903 = vmatprep.subr.bf16.mxu1 %v967_v63 }
  0x30   :  { %882 = vmatpush3.bf16.msra.mxu0 %v968_v0 }
  0x31   :  { %883 = vmatprep.subr.bf16.mxu0 %v970_v1  ;;  %904 = vmatpush3.bf16.msra.mxu1 %v969_v2 }
  0x32   :  { %905 = vmatprep.subr.bf16.mxu1 %v971_v3 }
  0x34   :  { %884 = vmatpush3.bf16.msra.mxu0 %v972_v4 }
  0x35   :  { %885 = vmatprep.subr.bf16.mxu0 %v974_v5 }
  0x36   :  { %7 = vsyncpa [#allocation3], 0  ;;  %906 = vmatpush3.bf16.msra.mxu1 %v973_v6  ;;  %v977_v10 = vld [vmem:[%s1241_s1 + $0x190] sm:$0xff]   ;;  %v979_v11 = vld [vmem:[%s1241_s1 + $0x1c8] sm:$0xff]   ;;  %v173_v17 = vrot.slane %v1138_v43, %v1134_v41  ;;  %vm751_vm0 = vcmask 8192  }
  0x37   :  { %907 = vmatprep.subr.bf16.mxu1 %v975_v7  ;;  %v980_v12 = vld [vmem:[%s1241_s1 + $0x108] sm:$0xff]   ;;  %v982_v13 = vld [vmem:[%s1241_s1 + $0x140] sm:$0xff]  }
  0x38   :  { %886 = vmatpush3.bf16.msra.mxu0 %v976_v8  ;;  %v981_v14 = vld [vmem:[%s1241_s1 + $0x188] sm:$0xff]   ;;  %v983_v15 = vld [vmem:[%s1241_s1 + $0x1c0] sm:$0xff]   ;;  %v189_v19 = vcombine.high %v173_v17, %v173_v17 }
  0x39   :  { %887 = vmatprep.subr.bf16.mxu0 %v978_v9  ;;  %v984_v16 = vld [vmem:[%s1241_s1 + $0x100] sm:$0xff]  }
  0x3a   :  { %908 = vmatpush3.bf16.msra.mxu1 %v977_v10  ;;  %v985_v18 = vld [vmem:[%s1241_s1 + $0x180] sm:$0xff]   ;;  %s1013_s1 = smov [#allocation2]  }
  0x3b   :  { %909 = vmatprep.subr.bf16.mxu1 %v979_v11  ;;  %s759_s24 = sshll.u32 %s1013_s1, 4  ;;  %s760_s24 = int_to_ptr.vmem [resolvable:$true] %s759_s24 }
  0x3c   :  { %888 = vmatpush3.bf16.msra.mxu0 %v980_v12  ;;  %s990_s25 = scalar_lea.vmem %s760_s24, 16  ;;  %s994_s26 = scalar_lea.vmem %s760_s24, 32 }
  0x3d   :  { %889 = vmatprep.subr.bf16.mxu0 %v982_v13  ;;  %p991_p0 = scmp.ne.s32.totalorder %s760_s24, %s990_s25  ;;  %p995_p1 = scmp.lt.s32.totalorder %s760_s24, %s760_s24 }
  0x3e   :  { %910 = vmatpush3.bf16.msra.mxu1 %v981_v14  ;;  %p996_p2 = scmp.lt.s32.totalorder %s994_s26, %s990_s25 }
  0x3f   :  { %911 = vmatprep.subr.bf16.mxu1 %v983_v15 }
  0x40   :  { %890 = vmatpush3.bf16.msra.mxu0 %v984_v16  ;;  %p997_p3 = por %p996_p2, %p995_p1 }
  0x42   :  { %912 = vmatpush3.bf16.msra.mxu1 %v985_v18  ;;  %p998_p4 = pnand %p997_p3, %p991_p0 }
  0x43   :  { %697 = vmatmul.mubr.bf16.vlgmr.msra.gmra.mxu0 %v173_v17 }
  0x45   :  { %737 = vmatmul.mubr.bf16.vlgmr.msra.gmra.mxu1 %v189_v19 }
  0xe3   :  { %v847_v20 = vpop.f32.mrf.mxu0 }
  0xe4   :  { %v869_v21 = vpop.f32.mrf.mxu1 }
  0xe5   :  { %v848_v22 = vpop.f32.mrf.mxu0 }
  0xe6   :  { %v870_v23 = vpop.f32.mrf.mxu1  ;;  %v849_v28 = vadd.f32 %v848_v22, %v847_v20 }
  0xe7   :  { %v850_v24 = vpop.f32.mrf.mxu0  ;;  %v871_v29 = vadd.f32 %v870_v23, %v869_v21 }
  0xe8   :  { %v872_v25 = vpop.f32.mrf.mxu1 }
  0xe9   :  { %v851_v26 = vpop.f32.mrf.mxu0  ;;  %v659_v33 = vadd.f32 %v871_v29, %v849_v28 }
  0xea   :  { %v873_v27 = vpop.f32.mrf.mxu1 }
 0x103   :  { %v891_v30 = vpop.f32.mrf.mxu0 }
 0x105   :  { %v913_v31 = vpop.f32.mrf.mxu1  ;;  %v892_v32 = vpop.f32.mrf.mxu0 }
 0x106   :  { %v893_v34 = vadd.f32 %v892_v32, %v891_v30 }
 0x107   :  { %v914_v35 = vpop.f32.mrf.mxu1  ;;  %v894_v36 = vpop.f32.mrf.mxu0 }
 0x108   :  { %v699_v37 = vadd.f32 %v893_v34, %v659_v33  ;;  %v915_v38 = vadd.f32 %v914_v35, %v913_v31 }
 0x109   :  { %v916_v39 = vpop.f32.mrf.mxu1  ;;  %v895_v40 = vpop.f32.mrf.mxu0 }
 0x10a   :  { %v739_v41 = vadd.f32 %v915_v38, %v699_v37 }
 0x10b   :  { %v917_v42 = vpop.f32.mrf.mxu1 }
 0x10c   :  { %v744_v43 = vsub.f32 0.0, %v739_v41 }
 0x10e   :  { %v745_v44 = vmul.f32 1.442695, %v744_v43 }
 0x110   :  { %986 = vpow2.f32 %v745_v44 }
 0x11d   :  { %v987_v45 = vpop.eup %986 }
 0x11e   :  { %v747_v46 = vadd.f32 1.0, %v987_v45 }
 0x120   :  { %988 = vrcp.f32 %v747_v46 }
 0x12d   :  { %v989_v47 = vpop.eup %988 }
 0x12e   :  { %v749_v48 = vmax.f32 %v989_v47, 0.0 }
 0x130   :  { %v750_v49 = vmin.f32 %v749_v48, 1.0 }
 0x132   :  { %752 = vst.msk [vmem:[#allocation2] sm:$0x1] %vm751_vm0, %v750_v49 }
 0x133   :  { %1001 = shalt.err (!%p998_p4)
}
 0x134   :  { %762 = dma.vmem_to_hbm [thread:$0]  %s760_s24, 16, %s1242_s2, [#allocation3]  }
 0x135   :  { %1010 = dma.done.wait [#allocation3], 16  }
 0x136   :  { %1011 = vsyncadd [#allocation3], 4294967280 }
 0x137   :  { %766 = vsyncpa [#allocation3], 1 }

</bundles_post_ra>
